<compile_context>
chip_gen: v5e
topology: v5e:2x2
jax: 0.10.0
libtpu: 0.0.40
codegen_flags: <defaults>
</compile_context>

<pallas_src>
import functools

import jax
import jax.numpy as jnp
import numpy as np
from jax import lax
from jax.experimental import pallas as pl
from jax.experimental.pallas import tpu as pltpu

EPS = 1e-5  # nn.BatchNorm1d default eps


def _round_up(a, m):
    return (a + m - 1) // m * m


# --------------------------------------------------------------------------
# Call A: accumulate BN statistics, emit fused scale/shift coefficients.
# grid = (pass, tile); pass 0 -> BN1 stats, pass 1 -> BN2 stats (+ finalize).
# --------------------------------------------------------------------------
def _stats_kernel(x_ref, w1_ref, w2_ref, bn_ref, a_ref, coef_ref,
                  s1, q1, s2, q2,
                  *, n_valid, n_bn, tn_out, num_tiles, has_pad, matmul_dtype):
    p = pl.program_id(0)
    i = pl.program_id(1)
    inv_n = jnp.float32(1.0 / n_bn)

    @pl.when((p == 0) & (i == 0))
    def _init():
        s1[...] = jnp.zeros_like(s1)
        q1[...] = jnp.zeros_like(q1)
        s2[...] = jnp.zeros_like(s2)
        q2[...] = jnp.zeros_like(q2)

    @pl.when(p == 0)
    def _bn1_stats():
        # Padded lanes of x are zero -> conv1 output is zero there -> no mask
        # needed for the BN1 sums.
        acc_s = jnp.zeros_like(s1[...])
        acc_q = jnp.zeros_like(q1[...])
        for k in range(3):
            y1 = jnp.dot(w1_ref[...], x_ref[k],
                         preferred_element_type=jnp.float32)
            acc_s += jnp.sum(y1, axis=-1, keepdims=True)
            acc_q += jnp.sum(y1 * y1, axis=-1, keepdims=True)
        s1[...] += acc_s
        q1[...] += acc_q

    @pl.when(p == 1)
    def _bn2_stats():
        mean1 = s1[...] * inv_n
        var1 = q1[...] * inv_n - mean1 * mean1
        scale1 = bn_ref[:, 0:1] * lax.rsqrt(var1 + EPS)
        shift1 = bn_ref[:, 1:2] - mean1 * scale1
        a1 = a_ref[0:1, 0:1]

        acc_s = jnp.zeros_like(s2[...])
        acc_q = jnp.zeros_like(q2[...])
        for k in range(3):
            y1 = jnp.dot(w1_ref[...], x_ref[k],
                         preferred_element_type=jnp.float32)
            h = y1 * scale1 + shift1
            h = jnp.where(h > 0, h, a1 * h)
            if has_pad:
                lane = i * tn_out + lax.broadcasted_iota(jnp.int32, (1, tn_out), 1)
                h = jnp.where(lane < n_valid, h, 0.0)   # keep pad lanes out of BN2
            y2 = jnp.dot(w2_ref[...], h.astype(matmul_dtype),
                         preferred_element_type=jnp.float32)
            acc_s += jnp.sum(y2, axis=-1, keepdims=True)
            acc_q += jnp.sum(y2 * y2, axis=-1, keepdims=True)
        s2[...] += acc_s
        q2[...] += acc_q

    @pl.when((p == 1) & (i == num_tiles - 1))
    def _finalize():
        mean1 = s1[...] * inv_n
        var1 = q1[...] * inv_n - mean1 * mean1
        scale1 = bn_ref[:, 0:1] * lax.rsqrt(var1 + EPS)
        shift1 = bn_ref[:, 1:2] - mean1 * scale1
        mean2 = s2[...] * inv_n
        var2 = q2[...] * inv_n - mean2 * mean2
        scale2 = bn_ref[:, 2:3] * lax.rsqrt(var2 + EPS)
        shift2 = bn_ref[:, 3:4] - mean2 * scale2
        coef_ref[:, 0:1] = scale1
        coef_ref[:, 1:2] = shift1
        coef_ref[:, 2:3] = scale2
        coef_ref[:, 3:4] = shift2


# --------------------------------------------------------------------------
# Call B: apply the full block per lane tile (independent tiles -> "parallel").
# --------------------------------------------------------------------------
def _apply_kernel(x_ref, wcat_ref, w2_ref, coef_ref, a_ref, o_ref,
                  *, c_out, downsample, matmul_dtype):
    scale1 = coef_ref[:, 0:1]
    shift1 = coef_ref[:, 1:2]
    scale2 = coef_ref[:, 2:3]
    shift2 = coef_ref[:, 3:4]
    a1 = a_ref[0:1, 0:1]
    a2 = a_ref[0:1, 1:2]

    pooled = None
    for k in range(3):
        xk = x_ref[k]                                            # (C_in, tn_out)
        # conv1 and the downsample conv fused into one MXU call.
        ycat = jnp.dot(wcat_ref[...], xk, preferred_element_type=jnp.float32)
        y1 = ycat[:c_out, :]
        h = y1 * scale1 + shift1                                 # BN1 (fused)
        h = jnp.where(h > 0, h, a1 * h)                          # PReLU1
        y2 = jnp.dot(w2_ref[...], h.astype(matmul_dtype),
                     preferred_element_type=jnp.float32)         # conv2
        y2 = y2 * scale2 + shift2                                # BN2 (fused)
        if downsample:
            y2 = y2 + ycat[c_out:, :]                            # conv_downsample(x)
        else:
            y2 = y2 + xk.astype(jnp.float32)                     # identity residual
        z = jnp.where(y2 > 0, y2, a2 * y2)                       # PReLU2
        pooled = z if pooled is None else jnp.maximum(pooled, z)  # MaxPool1d(3)
    o_ref[...] = pooled.astype(o_ref.dtype)


def resblock_forward(x, params, *, downsample, tile_out=512,
                     matmul_dtype=jnp.bfloat16):
    """x: (B, C_in, T) float32 (NCT, like PyTorch). Returns (B, C_out, T // 3)."""
    B, c_in, T = x.shape
    assert T % 3 == 0, "this kernel requires T % 3 == 0"
    c_out = params["w1"].shape[0]
    assert downsample == (c_in != c_out)

    t_out = T // 3
    n_out = B * t_out          # true output lanes
    n_bn = B * T               # BatchNorm sample count (over batch and time)

    # Lane tiling: 128-aligned tile, lane axis padded up to a whole number of tiles.
    num_tiles = -(-n_out // tile_out)
    tn_out = _round_up(-(-n_out // num_tiles), 128)
    n_pad = num_tiles * tn_out
    has_pad = n_pad != n_out

    # (B, C, T) -> (3, C, B*t_out): phase k holds x[..., 3m + k].
    x3 = jnp.transpose(x.reshape(B, c_in, t_out, 3), (3, 1, 0, 2))
    x3 = x3.reshape(3, c_in, n_out)
    if has_pad:
        x3 = jnp.pad(x3, ((0, 0), (0, 0), (0, n_pad - n_out)))
    x3 = x3.astype(matmul_dtype)

    w1 = params["w1"].astype(matmul_dtype)
    w2 = params["w2"].astype(matmul_dtype)
    if downsample:
        wcat = jnp.concatenate([params["w1"], params["wd"]], axis=0).astype(matmul_dtype)
    else:
        wcat = w1
    bn_aff = jnp.stack([params["g1"], params["b1"], params["g2"], params["b2"]],
                       axis=1).astype(jnp.float32)                      # (C_out, 4)
    prelu = jnp.array([[params["a1"], params["a2"]]], jnp.float32)       # (1, 2)

    # ---- call A: BN statistics -> fused scale/shift coefficients -----------
    coefs = pl.pallas_call(
        functools.partial(_stats_kernel, n_valid=n_out, n_bn=n_bn,
                          tn_out=tn_out, num_tiles=num_tiles,
                          has_pad=has_pad, matmul_dtype=matmul_dtype),
        out_shape=jax.ShapeDtypeStruct((c_out, 4), jnp.float32),
        grid=(2, num_tiles),
        in_specs=[
            pl.BlockSpec((3, c_in, tn_out), lambda p, i: (0, 0, i)),
            pl.BlockSpec((c_out, c_in), lambda p, i: (0, 0)),
            pl.BlockSpec((c_out, c_out), lambda p, i: (0, 0)),
            pl.BlockSpec((c_out, 4), lambda p, i: (0, 0)),
            pl.BlockSpec((1, 2), lambda p, i: (0, 0)),
        ],
        out_specs=pl.BlockSpec((c_out, 4), lambda p, i: (0, 0)),
        scratch_shapes=[pltpu.VMEM((c_out, 1), jnp.float32)] * 4,
        compiler_params=pltpu.CompilerParams(
            dimension_semantics=("arbitrary", "arbitrary")),
    )(x3, w1, w2, bn_aff, prelu)

    # ---- call B: apply the block, pool, lane-dense stores -------------------
    out2d = pl.pallas_call(
        functools.partial(_apply_kernel, c_out=c_out, downsample=downsample,
                          matmul_dtype=matmul_dtype),
        out_shape=jax.ShapeDtypeStruct((c_out, n_pad), jnp.float32),
        grid=(num_tiles,),
        in_specs=[
            pl.BlockSpec((3, c_in, tn_out), lambda i: (0, 0, i)),
            pl.BlockSpec(wcat.shape, lambda i: (0, 0)),
            pl.BlockSpec((c_out, c_out), lambda i: (0, 0)),
            pl.BlockSpec((c_out, 4), lambda i: (0, 0)),
            pl.BlockSpec((1, 2), lambda i: (0, 0)),
        ],
        out_specs=pl.BlockSpec((c_out, tn_out), lambda i: (0, i)),
        compiler_params=pltpu.CompilerParams(
            dimension_semantics=("parallel",)),
    )(x3, wcat, w2, coefs, prelu)

    out = out2d[:, :n_out].reshape(c_out, B, t_out)
    return jnp.transpose(out, (1, 0, 2))


def resblock_reference(x, params, *, downsample):
    """Plain-JAX f32 reference matching the PyTorch forward (training-mode BN)."""
    def bn(y, g, b):
        m = y.mean(axis=(0, 2), keepdims=True)
        v = ((y - m) ** 2).mean(axis=(0, 2), keepdims=True)
        return g.reshape(1, -1, 1) * (y - m) / jnp.sqrt(v + EPS) + b.reshape(1, -1, 1)

    def prelu(y, a):
        return jnp.where(y > 0, y, a * y)

    y = jnp.einsum("oi,bit->bot", params["w1"], x)
    y = prelu(bn(y, params["g1"], params["b1"]), params["a1"])
    y = jnp.einsum("oi,bit->bot", params["w2"], y)
    y = bn(y, params["g2"], params["b2"])
    y = y + (jnp.einsum("oi,bit->bot", params["wd"], x) if downsample else x)
    y = prelu(y, params["a2"])
    B, C, T = y.shape
    return y.reshape(B, C, T // 3, 3).max(axis=-1)


def _make_params(key, c_in, c_out):
    ks = jax.random.split(key, 7)
    return {
        "w1": jax.random.normal(ks[0], (c_out, c_in), jnp.float32) / np.sqrt(c_in),
        "w2": jax.random.normal(ks[1], (c_out, c_out), jnp.float32) / np.sqrt(c_out),
        "wd": jax.random.normal(ks[2], (c_out, c_in), jnp.float32) / np.sqrt(c_in),
        "g1": 1.0 + 0.1 * jax.random.normal(ks[3], (c_out,), jnp.float32),
        "b1": 0.1 * jax.random.normal(ks[4], (c_out,), jnp.float32),
        "g2": 1.0 + 0.1 * jax.random.normal(ks[5], (c_out,), jnp.float32),
        "b2": 0.1 * jax.random.normal(ks[6], (c_out,), jnp.float32),
        "a1": 0.25,                            # nn.PReLU() default init
        "a2": 0.25,
    }


if __name__ == "__main__":
    key = jax.random.PRNGKey(0)
    k1, k2, k3, k4 = jax.random.split(key, 4)

    # Config 1: downsample path (in_dims != out_dims), multi-tile + padded lanes.
    B, C_IN, C_OUT, T = 2, 16, 8, 900
    x = jax.random.normal(k1, (B, C_IN, T), jnp.float32)
    params = _make_params(k2, C_IN, C_OUT)
    out = jax.block_until_ready(resblock_forward(x, params, downsample=True))
    ref = resblock_reference(x, params, downsample=True)
    assert out.shape == (B, C_OUT, T // 3), out.shape
    # bf16 MXU operands (f32 accumulate) vs a pure-f32 reference.
    np.testing.assert_allclose(np.asarray(out), np.asarray(ref), rtol=3e-2, atol=3e-2)

    # Config 2: identity residual (in_dims == out_dims), single tile, no padding.
    B2, C2, T2 = 2, 8, 384
    x2 = jax.random.normal(k3, (B2, C2, T2), jnp.float32)
    params2 = _make_params(k4, C2, C2)
    out2 = jax.block_until_ready(resblock_forward(x2, params2, downsample=False))
    ref2 = resblock_reference(x2, params2, downsample=False)
    assert out2.shape == (B2, C2, T2 // 3), out2.shape
    np.testing.assert_allclose(np.asarray(out2), np.asarray(ref2), rtol=3e-2, atol=3e-2)

    print("KERNEL_OK")
</pallas_src>

<mosaic_0001>
module attributes {stable_mosaic.version = 11 : i64} {
  func.func @_stats_kernel(%arg0: i32, %arg1: i32, %arg2: memref<3x16x384xbf16, #tpu.memory_space<vmem>>, %arg3: memref<8x16xbf16, #tpu.memory_space<vmem>>, %arg4: memref<8x8xbf16, #tpu.memory_space<vmem>>, %arg5: memref<8x4xf32, #tpu.memory_space<vmem>>, %arg6: memref<1x2xf32, #tpu.memory_space<vmem>>, %arg7: memref<8x4xf32, #tpu.memory_space<vmem>>, %arg8: memref<8x1xf32, #tpu.memory_space<vmem>>, %arg9: memref<8x1xf32, #tpu.memory_space<vmem>>, %arg10: memref<8x1xf32, #tpu.memory_space<vmem>>, %arg11: memref<8x1xf32, #tpu.memory_space<vmem>>) attributes {dimension_semantics = [#tpu.dimension_semantics<arbitrary>, #tpu.dimension_semantics<arbitrary>], iteration_bounds = array<i64: 2, 2>, scalar_prefetch = 0 : i64, scratch_operands = 4 : i64, tpu.core_type = #tpu.core_type<tc>, window_params = [{transform_indices = @transform_0, window_bounds = array<i64: 3, 16, 384>}, {pipeline_mode = #tpu.pipeline_mode<synchronous>, transform_indices = @transform_1, window_bounds = array<i64: 8, 16>}, {pipeline_mode = #tpu.pipeline_mode<synchronous>, transform_indices = @transform_2, window_bounds = array<i64: 8, 8>}, {pipeline_mode = #tpu.pipeline_mode<synchronous>, transform_indices = @transform_3, window_bounds = array<i64: 8, 4>}, {pipeline_mode = #tpu.pipeline_mode<synchronous>, transform_indices = @transform_4, window_bounds = array<i64: 1, 2>}, {pipeline_mode = #tpu.pipeline_mode<synchronous>, transform_indices = @transform_5, window_bounds = array<i64: 8, 4>}]} {
    %c0_i32 = arith.constant 0 : i32
    %0 = arith.cmpi eq, %arg0, %c0_i32 : i32
    %c0_i32_0 = arith.constant 0 : i32
    %1 = arith.cmpi eq, %arg1, %c0_i32_0 : i32
    %2 = arith.andi %0, %1 : i1
    %3 = arith.extui %2 : i1 to i32
    %c0_i32_1 = arith.constant 0 : i32
    %4 = arith.cmpi ne, %3, %c0_i32_1 : i32
    scf.if %4 {
      %cst_9 = arith.constant 0.000000e+00 : f32
      %16 = vector.broadcast %cst_9 : f32 to vector<8x1xf32>
      %c0 = arith.constant 0 : index
      %c0_10 = arith.constant 0 : index
      %17 = vector.load %arg8[%c0, %c0_10] : memref<8x1xf32, #tpu.memory_space<vmem>>, vector<8x1xf32>
      tpu.vector_store %arg8[%c0, %c0_10], %16 {strides = array<i32>} : memref<8x1xf32, #tpu.memory_space<vmem>>, vector<8x1xf32>,
      %cst_11 = arith.constant 0.000000e+00 : f32
      %18 = vector.broadcast %cst_11 : f32 to vector<8x1xf32>
      %c0_12 = arith.constant 0 : index
      %c0_13 = arith.constant 0 : index
      %19 = vector.load %arg9[%c0_12, %c0_13] : memref<8x1xf32, #tpu.memory_space<vmem>>, vector<8x1xf32>
      tpu.vector_store %arg9[%c0_12, %c0_13], %18 {strides = array<i32>} : memref<8x1xf32, #tpu.memory_space<vmem>>, vector<8x1xf32>,
      %cst_14 = arith.constant 0.000000e+00 : f32
      %20 = vector.broadcast %cst_14 : f32 to vector<8x1xf32>
      %c0_15 = arith.constant 0 : index
      %c0_16 = arith.constant 0 : index
      %21 = vector.load %arg10[%c0_15, %c0_16] : memref<8x1xf32, #tpu.memory_space<vmem>>, vector<8x1xf32>
      tpu.vector_store %arg10[%c0_15, %c0_16], %20 {strides = array<i32>} : memref<8x1xf32, #tpu.memory_space<vmem>>, vector<8x1xf32>,
      %cst_17 = arith.constant 0.000000e+00 : f32
      %22 = vector.broadcast %cst_17 : f32 to vector<8x1xf32>
      %c0_18 = arith.constant 0 : index
      %c0_19 = arith.constant 0 : index
      %23 = vector.load %arg11[%c0_18, %c0_19] : memref<8x1xf32, #tpu.memory_space<vmem>>, vector<8x1xf32>
      tpu.vector_store %arg11[%c0_18, %c0_19], %22 {strides = array<i32>} : memref<8x1xf32, #tpu.memory_space<vmem>>, vector<8x1xf32>,
    } else {
    }
    %c0_i32_2 = arith.constant 0 : i32
    %5 = arith.cmpi eq, %arg0, %c0_i32_2 : i32
    %6 = arith.extui %5 : i1 to i32
    %c0_i32_3 = arith.constant 0 : i32
    %7 = arith.cmpi ne, %6, %c0_i32_3 : i32
    scf.if %7 {
      %cst_9 = arith.constant 0.000000e+00 : f32
      %16 = vector.broadcast %cst_9 : f32 to vector<8x1xf32>
      %cst_10 = arith.constant 0.000000e+00 : f32
      %17 = vector.broadcast %cst_10 : f32 to vector<8x1xf32>
      %c0 = arith.constant 0 : index
      %c0_11 = arith.constant 0 : index
      %18 = vector.load %arg3[%c0, %c0_11] : memref<8x16xbf16, #tpu.memory_space<vmem>>, vector<8x16xbf16>
      %c0_12 = arith.constant 0 : index
      %c0_13 = arith.constant 0 : index
      %c0_14 = arith.constant 0 : index
      %19 = vector.load %arg2[%c0_12, %c0_13, %c0_14] : memref<3x16x384xbf16, #tpu.memory_space<vmem>>, vector<1x16x384xbf16>
      %20 = vector.shape_cast %19 : vector<1x16x384xbf16> to vector<16x384xbf16>
      %cst_15 = arith.constant dense<0.000000e+00> : vector<8x384xf32>
      %21 = tpu.matmul %18, %20, %cst_15 {dimension_numbers = #tpu.dot_dimension_numbers<[1], [0], [0], [1], [0, 0, 1, 1], [], []>} : vector<8x16xbf16>, vector<16x384xbf16>, vector<8x384xf32> -> vector<8x384xf32>
      %cst_16 = arith.constant dense<0.000000e+00> : vector<8xf32>
      %22 = vector.multi_reduction <add>, %21, %cst_16 [1] : vector<8x384xf32> to vector<8xf32>
      %23 = vector.shape_cast %22 : vector<8xf32> to vector<8x1xf32>
      %24 = arith.addf %16, %23 : vector<8x1xf32>
      %25 = arith.mulf %21, %21 : vector<8x384xf32>
      %cst_17 = arith.constant dense<0.000000e+00> : vector<8xf32>
      %26 = vector.multi_reduction <add>, %25, %cst_17 [1] : vector<8x384xf32> to vector<8xf32>
      %27 = vector.shape_cast %26 : vector<8xf32> to vector<8x1xf32>
      %28 = arith.addf %17, %27 : vector<8x1xf32>
      %c0_18 = arith.constant 0 : index
      %c0_19 = arith.constant 0 : index
      %29 = vector.load %arg3[%c0_18, %c0_19] : memref<8x16xbf16, #tpu.memory_space<vmem>>, vector<8x16xbf16>
      %c1 = arith.constant 1 : index
      %c0_20 = arith.constant 0 : index
      %c0_21 = arith.constant 0 : index
      %30 = vector.load %arg2[%c1, %c0_20, %c0_21] : memref<3x16x384xbf16, #tpu.memory_space<vmem>>, vector<1x16x384xbf16>
      %31 = vector.shape_cast %30 : vector<1x16x384xbf16> to vector<16x384xbf16>
      %cst_22 = arith.constant dense<0.000000e+00> : vector<8x384xf32>
      %32 = tpu.matmul %29, %31, %cst_22 {dimension_numbers = #tpu.dot_dimension_numbers<[1], [0], [0], [1], [0, 0, 1, 1], [], []>} : vector<8x16xbf16>, vector<16x384xbf16>, vector<8x384xf32> -> vector<8x384xf32>
      %cst_23 = arith.constant dense<0.000000e+00> : vector<8xf32>
      %33 = vector.multi_reduction <add>, %32, %cst_23 [1] : vector<8x384xf32> to vector<8xf32>
      %34 = vector.shape_cast %33 : vector<8xf32> to vector<8x1xf32>
      %35 = arith.addf %24, %34 : vector<8x1xf32>
      %36 = arith.mulf %32, %32 : vector<8x384xf32>
      %cst_24 = arith.constant dense<0.000000e+00> : vector<8xf32>
      %37 = vector.multi_reduction <add>, %36, %cst_24 [1] : vector<8x384xf32> to vector<8xf32>
      %38 = vector.shape_cast %37 : vector<8xf32> to vector<8x1xf32>
      %39 = arith.addf %28, %38 : vector<8x1xf32>
      %c0_25 = arith.constant 0 : index
      %c0_26 = arith.constant 0 : index
      %40 = vector.load %arg3[%c0_25, %c0_26] : memref<8x16xbf16, #tpu.memory_space<vmem>>, vector<8x16xbf16>
      %c2 = arith.constant 2 : index
      %c0_27 = arith.constant 0 : index
      %c0_28 = arith.constant 0 : index
      %41 = vector.load %arg2[%c2, %c0_27, %c0_28] : memref<3x16x384xbf16, #tpu.memory_space<vmem>>, vector<1x16x384xbf16>
      %42 = vector.shape_cast %41 : vector<1x16x384xbf16> to vector<16x384xbf16>
      %cst_29 = arith.constant dense<0.000000e+00> : vector<8x384xf32>
      %43 = tpu.matmul %40, %42, %cst_29 {dimension_numbers = #tpu.dot_dimension_numbers<[1], [0], [0], [1], [0, 0, 1, 1], [], []>} : vector<8x16xbf16>, vector<16x384xbf16>, vector<8x384xf32> -> vector<8x384xf32>
      %cst_30 = arith.constant dense<0.000000e+00> : vector<8xf32>
      %44 = vector.multi_reduction <add>, %43, %cst_30 [1] : vector<8x384xf32> to vector<8xf32>
      %45 = vector.shape_cast %44 : vector<8xf32> to vector<8x1xf32>
      %46 = arith.addf %35, %45 : vector<8x1xf32>
      %47 = arith.mulf %43, %43 : vector<8x384xf32>
      %cst_31 = arith.constant dense<0.000000e+00> : vector<8xf32>
      %48 = vector.multi_reduction <add>, %47, %cst_31 [1] : vector<8x384xf32> to vector<8xf32>
      %49 = vector.shape_cast %48 : vector<8xf32> to vector<8x1xf32>
      %50 = arith.addf %39, %49 : vector<8x1xf32>
      %c0_32 = arith.constant 0 : index
      %c0_33 = arith.constant 0 : index
      %51 = vector.load %arg8[%c0_32, %c0_33] : memref<8x1xf32, #tpu.memory_space<vmem>>, vector<8x1xf32>
      %52 = arith.addf %51, %46 : vector<8x1xf32>
      %c0_34 = arith.constant 0 : index
      %c0_35 = arith.constant 0 : index
      %53 = vector.load %arg8[%c0_34, %c0_35] : memref<8x1xf32, #tpu.memory_space<vmem>>, vector<8x1xf32>
      tpu.vector_store %arg8[%c0_34, %c0_35], %52 {strides = array<i32>} : memref<8x1xf32, #tpu.memory_space<vmem>>, vector<8x1xf32>,
      %c0_36 = arith.constant 0 : index
      %c0_37 = arith.constant 0 : index
      %54 = vector.load %arg9[%c0_36, %c0_37] : memref<8x1xf32, #tpu.memory_space<vmem>>, vector<8x1xf32>
      %55 = arith.addf %54, %50 : vector<8x1xf32>
      %c0_38 = arith.constant 0 : index
      %c0_39 = arith.constant 0 : index
      %56 = vector.load %arg9[%c0_38, %c0_39] : memref<8x1xf32, #tpu.memory_space<vmem>>, vector<8x1xf32>
      tpu.vector_store %arg9[%c0_38, %c0_39], %55 {strides = array<i32>} : memref<8x1xf32, #tpu.memory_space<vmem>>, vector<8x1xf32>,
    } else {
    }
    %c1_i32 = arith.constant 1 : i32
    %8 = arith.cmpi eq, %arg0, %c1_i32 : i32
    %9 = arith.extui %8 : i1 to i32
    %cst = arith.constant 5.55555569E-4 : f32
    %c0_i32_4 = arith.constant 0 : i32
    %10 = arith.cmpi ne, %9, %c0_i32_4 : i32
    scf.if %10 {
      %c0 = arith.constant 0 : index
      %c0_9 = arith.constant 0 : index
      %16 = vector.load %arg8[%c0, %c0_9] : memref<8x1xf32, #tpu.memory_space<vmem>>, vector<8x1xf32>
      %17 = vector.broadcast %cst : f32 to vector<8x1xf32>
      %18 = arith.mulf %16, %17 : vector<8x1xf32>
      %c0_10 = arith.constant 0 : index
      %c0_11 = arith.constant 0 : index
      %19 = vector.load %arg9[%c0_10, %c0_11] : memref<8x1xf32, #tpu.memory_space<vmem>>, vector<8x1xf32>
      %20 = vector.broadcast %cst : f32 to vector<8x1xf32>
      %21 = arith.mulf %19, %20 : vector<8x1xf32>
      %22 = arith.mulf %18, %18 : vector<8x1xf32>
      %23 = arith.subf %21, %22 : vector<8x1xf32>
      %c0_12 = arith.constant 0 : index
      %c0_13 = arith.constant 0 : index
      %24 = vector.load %arg5[%c0_12, %c0_13] : memref<8x4xf32, #tpu.memory_space<vmem>>, vector<8x1xf32>
      %cst_14 = arith.constant 9.99999974E-6 : f32
      %25 = vector.broadcast %cst_14 : f32 to vector<8x1xf32>
      %26 = arith.addf %23, %25 : vector<8x1xf32>
      %27 = math.rsqrt %26 : vector<8x1xf32>
      %28 = arith.mulf %24, %27 : vector<8x1xf32>
      %c0_15 = arith.constant 0 : index
      %c1 = arith.constant 1 : index
      %29 = vector.load %arg5[%c0_15, %c1] : memref<8x4xf32, #tpu.memory_space<vmem>>, vector<8x1xf32>
      %30 = arith.mulf %18, %28 : vector<8x1xf32>
      %31 = arith.subf %29, %30 : vector<8x1xf32>
      %c0_16 = arith.constant 0 : index
      %c0_17 = arith.constant 0 : index
      %32 = vector.load %arg6[%c0_16, %c0_17] : memref<1x2xf32, #tpu.memory_space<vmem>>, vector<1x1xf32>
      %cst_18 = arith.constant 0.000000e+00 : f32
      %33 = vector.broadcast %cst_18 : f32 to vector<8x1xf32>
      %cst_19 = arith.constant 0.000000e+00 : f32
      %34 = vector.broadcast %cst_19 : f32 to vector<8x1xf32>
      %c0_20 = arith.constant 0 : index
      %c0_21 = arith.constant 0 : index
      %35 = vector.load %arg3[%c0_20, %c0_21] : memref<8x16xbf16, #tpu.memory_space<vmem>>, vector<8x16xbf16>
      %c0_22 = arith.constant 0 : index
      %c0_23 = arith.constant 0 : index
      %c0_24 = arith.constant 0 : index
      %36 = vector.load %arg2[%c0_22, %c0_23, %c0_24] : memref<3x16x384xbf16, #tpu.memory_space<vmem>>, vector<1x16x384xbf16>
      %37 = vector.shape_cast %36 : vector<1x16x384xbf16> to vector<16x384xbf16>
      %cst_25 = arith.constant dense<0.000000e+00> : vector<8x384xf32>
      %38 = tpu.matmul %35, %37, %cst_25 {dimension_numbers = #tpu.dot_dimension_numbers<[1], [0], [0], [1], [0, 0, 1, 1], [], []>} : vector<8x16xbf16>, vector<16x384xbf16>, vector<8x384xf32> -> vector<8x384xf32>
      %39 = vector.broadcast %28 : vector<8x1xf32> to vector<8x384xf32>
      %40 = arith.mulf %38, %39 : vector<8x384xf32>
      %41 = vector.broadcast %31 : vector<8x1xf32> to vector<8x384xf32>
      %42 = arith.addf %40, %41 : vector<8x384xf32>
      %cst_26 = arith.constant 0.000000e+00 : f32
      %43 = vector.broadcast %cst_26 : f32 to vector<8x384xf32>
      %44 = arith.cmpf ogt, %42, %43 : vector<8x384xf32>
      %45 = vector.broadcast %32 : vector<1x1xf32> to vector<8x384xf32>
      %46 = arith.mulf %45, %42 : vector<8x384xf32>
      %47 = arith.select %44, %42, %46 : vector<8x384xi1>, vector<8x384xf32>
      %c384_i32 = arith.constant 384 : i32
      %48 = arith.muli %arg1, %c384_i32 : i32
      %49 = tpu.iota {dimensions = array<i32: 1>} : vector<1x384xi32>
      %50 = vector.broadcast %48 : i32 to vector<1x384xi32>
      %51 = arith.addi %50, %49 : vector<1x384xi32>
      %c600_i32 = arith.constant 600 : i32
      %52 = vector.broadcast %c600_i32 : i32 to vector<1x384xi32>
      %53 = arith.cmpi slt, %51, %52 : vector<1x384xi32>
      %cst_27 = arith.constant 0.000000e+00 : f32
      %54 = vector.shape_cast %53 : vector<1x384xi1> to vector<1x384xi1>
      %55 = vector.broadcast %54 : vector<1x384xi1> to vector<8x384xi1>
      %56 = vector.broadcast %cst_27 : f32 to vector<8x384xf32>
      %57 = arith.select %55, %47, %56 : vector<8x384xi1>, vector<8x384xf32>
      %c0_28 = arith.constant 0 : index
      %c0_29 = arith.constant 0 : index
      %58 = vector.load %arg4[%c0_28, %c0_29] : memref<8x8xbf16, #tpu.memory_space<vmem>>, vector<8x8xbf16>
      %59 = arith.truncf %57 : vector<8x384xf32> to vector<8x384xbf16>
      %cst_30 = arith.constant dense<0.000000e+00> : vector<8x384xf32>
      %60 = tpu.matmul %58, %59, %cst_30 {dimension_numbers = #tpu.dot_dimension_numbers<[1], [0], [0], [1], [0, 0, 1, 1], [], []>} : vector<8x8xbf16>, vector<8x384xbf16>, vector<8x384xf32> -> vector<8x384xf32>
      %cst_31 = arith.constant dense<0.000000e+00> : vector<8xf32>
      %61 = vector.multi_reduction <add>, %60, %cst_31 [1] : vector<8x384xf32> to vector<8xf32>
      %62 = vector.shape_cast %61 : vector<8xf32> to vector<8x1xf32>
      %63 = arith.addf %33, %62 : vector<8x1xf32>
      %64 = arith.mulf %60, %60 : vector<8x384xf32>
      %cst_32 = arith.constant dense<0.000000e+00> : vector<8xf32>
      %65 = vector.multi_reduction <add>, %64, %cst_32 [1] : vector<8x384xf32> to vector<8xf32>
      %66 = vector.shape_cast %65 : vector<8xf32> to vector<8x1xf32>
      %67 = arith.addf %34, %66 : vector<8x1xf32>
      %c0_33 = arith.constant 0 : index
      %c0_34 = arith.constant 0 : index
      %68 = vector.load %arg3[%c0_33, %c0_34] : memref<8x16xbf16, #tpu.memory_space<vmem>>, vector<8x16xbf16>
      %c1_35 = arith.constant 1 : index
      %c0_36 = arith.constant 0 : index
      %c0_37 = arith.constant 0 : index
      %69 = vector.load %arg2[%c1_35, %c0_36, %c0_37] : memref<3x16x384xbf16, #tpu.memory_space<vmem>>, vector<1x16x384xbf16>
      %70 = vector.shape_cast %69 : vector<1x16x384xbf16> to vector<16x384xbf16>
      %cst_38 = arith.constant dense<0.000000e+00> : vector<8x384xf32>
      %71 = tpu.matmul %68, %70, %cst_38 {dimension_numbers = #tpu.dot_dimension_numbers<[1], [0], [0], [1], [0, 0, 1, 1], [], []>} : vector<8x16xbf16>, vector<16x384xbf16>, vector<8x384xf32> -> vector<8x384xf32>
      %72 = vector.broadcast %28 : vector<8x1xf32> to vector<8x384xf32>
      %73 = arith.mulf %71, %72 : vector<8x384xf32>
      %74 = vector.broadcast %31 : vector<8x1xf32> to vector<8x384xf32>
      %75 = arith.addf %73, %74 : vector<8x384xf32>
      %cst_39 = arith.constant 0.000000e+00 : f32
      %76 = vector.broadcast %cst_39 : f32 to vector<8x384xf32>
      %77 = arith.cmpf ogt, %75, %76 : vector<8x384xf32>
      %78 = vector.broadcast %32 : vector<1x1xf32> to vector<8x384xf32>
      %79 = arith.mulf %78, %75 : vector<8x384xf32>
      %80 = arith.select %77, %75, %79 : vector<8x384xi1>, vector<8x384xf32>
      %c384_i32_40 = arith.constant 384 : i32
      %81 = arith.muli %arg1, %c384_i32_40 : i32
      %82 = tpu.iota {dimensions = array<i32: 1>} : vector<1x384xi32>
      %83 = vector.broadcast %81 : i32 to vector<1x384xi32>
      %84 = arith.addi %83, %82 : vector<1x384xi32>
      %c600_i32_41 = arith.constant 600 : i32
      %85 = vector.broadcast %c600_i32_41 : i32 to vector<1x384xi32>
      %86 = arith.cmpi slt, %84, %85 : vector<1x384xi32>
      %cst_42 = arith.constant 0.000000e+00 : f32
      %87 = vector.shape_cast %86 : vector<1x384xi1> to vector<1x384xi1>
      %88 = vector.broadcast %87 : vector<1x384xi1> to vector<8x384xi1>
      %89 = vector.broadcast %cst_42 : f32 to vector<8x384xf32>
      %90 = arith.select %88, %80, %89 : vector<8x384xi1>, vector<8x384xf32>
      %c0_43 = arith.constant 0 : index
      %c0_44 = arith.constant 0 : index
      %91 = vector.load %arg4[%c0_43, %c0_44] : memref<8x8xbf16, #tpu.memory_space<vmem>>, vector<8x8xbf16>
      %92 = arith.truncf %90 : vector<8x384xf32> to vector<8x384xbf16>
      %cst_45 = arith.constant dense<0.000000e+00> : vector<8x384xf32>
      %93 = tpu.matmul %91, %92, %cst_45 {dimension_numbers = #tpu.dot_dimension_numbers<[1], [0], [0], [1], [0, 0, 1, 1], [], []>} : vector<8x8xbf16>, vector<8x384xbf16>, vector<8x384xf32> -> vector<8x384xf32>
      %cst_46 = arith.constant dense<0.000000e+00> : vector<8xf32>
      %94 = vector.multi_reduction <add>, %93, %cst_46 [1] : vector<8x384xf32> to vector<8xf32>
      %95 = vector.shape_cast %94 : vector<8xf32> to vector<8x1xf32>
      %96 = arith.addf %63, %95 : vector<8x1xf32>
      %97 = arith.mulf %93, %93 : vector<8x384xf32>
      %cst_47 = arith.constant dense<0.000000e+00> : vector<8xf32>
      %98 = vector.multi_reduction <add>, %97, %cst_47 [1] : vector<8x384xf32> to vector<8xf32>
      %99 = vector.shape_cast %98 : vector<8xf32> to vector<8x1xf32>
      %100 = arith.addf %67, %99 : vector<8x1xf32>
      %c0_48 = arith.constant 0 : index
      %c0_49 = arith.constant 0 : index
      %101 = vector.load %arg3[%c0_48, %c0_49] : memref<8x16xbf16, #tpu.memory_space<vmem>>, vector<8x16xbf16>
      %c2 = arith.constant 2 : index
      %c0_50 = arith.constant 0 : index
      %c0_51 = arith.constant 0 : index
      %102 = vector.load %arg2[%c2, %c0_50, %c0_51] : memref<3x16x384xbf16, #tpu.memory_space<vmem>>, vector<1x16x384xbf16>
      %103 = vector.shape_cast %102 : vector<1x16x384xbf16> to vector<16x384xbf16>
      %cst_52 = arith.constant dense<0.000000e+00> : vector<8x384xf32>
      %104 = tpu.matmul %101, %103, %cst_52 {dimension_numbers = #tpu.dot_dimension_numbers<[1], [0], [0], [1], [0, 0, 1, 1], [], []>} : vector<8x16xbf16>, vector<16x384xbf16>, vector<8x384xf32> -> vector<8x384xf32>
      %105 = vector.broadcast %28 : vector<8x1xf32> to vector<8x384xf32>
      %106 = arith.mulf %104, %105 : vector<8x384xf32>
      %107 = vector.broadcast %31 : vector<8x1xf32> to vector<8x384xf32>
      %108 = arith.addf %106, %107 : vector<8x384xf32>
      %cst_53 = arith.constant 0.000000e+00 : f32
      %109 = vector.broadcast %cst_53 : f32 to vector<8x384xf32>
      %110 = arith.cmpf ogt, %108, %109 : vector<8x384xf32>
      %111 = vector.broadcast %32 : vector<1x1xf32> to vector<8x384xf32>
      %112 = arith.mulf %111, %108 : vector<8x384xf32>
      %113 = arith.select %110, %108, %112 : vector<8x384xi1>, vector<8x384xf32>
      %c384_i32_54 = arith.constant 384 : i32
      %114 = arith.muli %arg1, %c384_i32_54 : i32
      %115 = tpu.iota {dimensions = array<i32: 1>} : vector<1x384xi32>
      %116 = vector.broadcast %114 : i32 to vector<1x384xi32>
      %117 = arith.addi %116, %115 : vector<1x384xi32>
      %c600_i32_55 = arith.constant 600 : i32
      %118 = vector.broadcast %c600_i32_55 : i32 to vector<1x384xi32>
      %119 = arith.cmpi slt, %117, %118 : vector<1x384xi32>
      %cst_56 = arith.constant 0.000000e+00 : f32
      %120 = vector.shape_cast %119 : vector<1x384xi1> to vector<1x384xi1>
      %121 = vector.broadcast %120 : vector<1x384xi1> to vector<8x384xi1>
      %122 = vector.broadcast %cst_56 : f32 to vector<8x384xf32>
      %123 = arith.select %121, %113, %122 : vector<8x384xi1>, vector<8x384xf32>
      %c0_57 = arith.constant 0 : index
      %c0_58 = arith.constant 0 : index
      %124 = vector.load %arg4[%c0_57, %c0_58] : memref<8x8xbf16, #tpu.memory_space<vmem>>, vector<8x8xbf16>
      %125 = arith.truncf %123 : vector<8x384xf32> to vector<8x384xbf16>
      %cst_59 = arith.constant dense<0.000000e+00> : vector<8x384xf32>
      %126 = tpu.matmul %124, %125, %cst_59 {dimension_numbers = #tpu.dot_dimension_numbers<[1], [0], [0], [1], [0, 0, 1, 1], [], []>} : vector<8x8xbf16>, vector<8x384xbf16>, vector<8x384xf32> -> vector<8x384xf32>
      %cst_60 = arith.constant dense<0.000000e+00> : vector<8xf32>
      %127 = vector.multi_reduction <add>, %126, %cst_60 [1] : vector<8x384xf32> to vector<8xf32>
      %128 = vector.shape_cast %127 : vector<8xf32> to vector<8x1xf32>
      %129 = arith.addf %96, %128 : vector<8x1xf32>
      %130 = arith.mulf %126, %126 : vector<8x384xf32>
      %cst_61 = arith.constant dense<0.000000e+00> : vector<8xf32>
      %131 = vector.multi_reduction <add>, %130, %cst_61 [1] : vector<8x384xf32> to vector<8xf32>
      %132 = vector.shape_cast %131 : vector<8xf32> to vector<8x1xf32>
      %133 = arith.addf %100, %132 : vector<8x1xf32>
      %c0_62 = arith.constant 0 : index
      %c0_63 = arith.constant 0 : index
      %134 = vector.load %arg10[%c0_62, %c0_63] : memref<8x1xf32, #tpu.memory_space<vmem>>, vector<8x1xf32>
      %135 = arith.addf %134, %129 : vector<8x1xf32>
      %c0_64 = arith.constant 0 : index
      %c0_65 = arith.constant 0 : index
      %136 = vector.load %arg10[%c0_64, %c0_65] : memref<8x1xf32, #tpu.memory_space<vmem>>, vector<8x1xf32>
      tpu.vector_store %arg10[%c0_64, %c0_65], %135 {strides = array<i32>} : memref<8x1xf32, #tpu.memory_space<vmem>>, vector<8x1xf32>,
      %c0_66 = arith.constant 0 : index
      %c0_67 = arith.constant 0 : index
      %137 = vector.load %arg11[%c0_66, %c0_67] : memref<8x1xf32, #tpu.memory_space<vmem>>, vector<8x1xf32>
      %138 = arith.addf %137, %133 : vector<8x1xf32>
      %c0_68 = arith.constant 0 : index
      %c0_69 = arith.constant 0 : index
      %139 = vector.load %arg11[%c0_68, %c0_69] : memref<8x1xf32, #tpu.memory_space<vmem>>, vector<8x1xf32>
      tpu.vector_store %arg11[%c0_68, %c0_69], %138 {strides = array<i32>} : memref<8x1xf32, #tpu.memory_space<vmem>>, vector<8x1xf32>,
    } else {
    }
    %c1_i32_5 = arith.constant 1 : i32
    %11 = arith.cmpi eq, %arg0, %c1_i32_5 : i32
    %c1_i32_6 = arith.constant 1 : i32
    %12 = arith.cmpi eq, %arg1, %c1_i32_6 : i32
    %13 = arith.andi %11, %12 : i1
    %14 = arith.extui %13 : i1 to i32
    %cst_7 = arith.constant 5.55555569E-4 : f32
    %c0_i32_8 = arith.constant 0 : i32
    %15 = arith.cmpi ne, %14, %c0_i32_8 : i32
    scf.if %15 {
      %c0 = arith.constant 0 : index
      %c0_9 = arith.constant 0 : index
      %16 = vector.load %arg8[%c0, %c0_9] : memref<8x1xf32, #tpu.memory_space<vmem>>, vector<8x1xf32>
      %17 = vector.broadcast %cst_7 : f32 to vector<8x1xf32>
      %18 = arith.mulf %16, %17 : vector<8x1xf32>
      %c0_10 = arith.constant 0 : index
      %c0_11 = arith.constant 0 : index
      %19 = vector.load %arg9[%c0_10, %c0_11] : memref<8x1xf32, #tpu.memory_space<vmem>>, vector<8x1xf32>
      %20 = vector.broadcast %cst_7 : f32 to vector<8x1xf32>
      %21 = arith.mulf %19, %20 : vector<8x1xf32>
      %22 = arith.mulf %18, %18 : vector<8x1xf32>
      %23 = arith.subf %21, %22 : vector<8x1xf32>
      %c0_12 = arith.constant 0 : index
      %c0_13 = arith.constant 0 : index
      %24 = vector.load %arg5[%c0_12, %c0_13] : memref<8x4xf32, #tpu.memory_space<vmem>>, vector<8x1xf32>
      %cst_14 = arith.constant 9.99999974E-6 : f32
      %25 = vector.broadcast %cst_14 : f32 to vector<8x1xf32>
      %26 = arith.addf %23, %25 : vector<8x1xf32>
      %27 = math.rsqrt %26 : vector<8x1xf32>
      %28 = arith.mulf %24, %27 : vector<8x1xf32>
      %c0_15 = arith.constant 0 : index
      %c1 = arith.constant 1 : index
      %29 = vector.load %arg5[%c0_15, %c1] : memref<8x4xf32, #tpu.memory_space<vmem>>, vector<8x1xf32>
      %30 = arith.mulf %18, %28 : vector<8x1xf32>
      %31 = arith.subf %29, %30 : vector<8x1xf32>
      %c0_16 = arith.constant 0 : index
      %c0_17 = arith.constant 0 : index
      %32 = vector.load %arg10[%c0_16, %c0_17] : memref<8x1xf32, #tpu.memory_space<vmem>>, vector<8x1xf32>
      %33 = vector.broadcast %cst_7 : f32 to vector<8x1xf32>
      %34 = arith.mulf %32, %33 : vector<8x1xf32>
      %c0_18 = arith.constant 0 : index
      %c0_19 = arith.constant 0 : index
      %35 = vector.load %arg11[%c0_18, %c0_19] : memref<8x1xf32, #tpu.memory_space<vmem>>, vector<8x1xf32>
      %36 = vector.broadcast %cst_7 : f32 to vector<8x1xf32>
      %37 = arith.mulf %35, %36 : vector<8x1xf32>
      %38 = arith.mulf %34, %34 : vector<8x1xf32>
      %39 = arith.subf %37, %38 : vector<8x1xf32>
      %c0_20 = arith.constant 0 : index
      %c2 = arith.constant 2 : index
      %40 = vector.load %arg5[%c0_20, %c2] : memref<8x4xf32, #tpu.memory_space<vmem>>, vector<8x1xf32>
      %cst_21 = arith.constant 9.99999974E-6 : f32
      %41 = vector.broadcast %cst_21 : f32 to vector<8x1xf32>
      %42 = arith.addf %39, %41 : vector<8x1xf32>
      %43 = math.rsqrt %42 : vector<8x1xf32>
      %44 = arith.mulf %40, %43 : vector<8x1xf32>
      %c0_22 = arith.constant 0 : index
      %c3 = arith.constant 3 : index
      %45 = vector.load %arg5[%c0_22, %c3] : memref<8x4xf32, #tpu.memory_space<vmem>>, vector<8x1xf32>
      %46 = arith.mulf %34, %44 : vector<8x1xf32>
      %47 = arith.subf %45, %46 : vector<8x1xf32>
      %c0_23 = arith.constant 0 : index
      %c0_24 = arith.constant 0 : index
      %48 = vector.load %arg7[%c0_23, %c0_24] : memref<8x4xf32, #tpu.memory_space<vmem>>, vector<8x1xf32>
      tpu.vector_store %arg7[%c0_23, %c0_24], %28 {strides = array<i32>} : memref<8x4xf32, #tpu.memory_space<vmem>>, vector<8x1xf32>,
      %c0_25 = arith.constant 0 : index
      %c1_26 = arith.constant 1 : index
      %49 = vector.load %arg7[%c0_25, %c1_26] : memref<8x4xf32, #tpu.memory_space<vmem>>, vector<8x1xf32>
      tpu.vector_store %arg7[%c0_25, %c1_26], %31 {strides = array<i32>} : memref<8x4xf32, #tpu.memory_space<vmem>>, vector<8x1xf32>,
      %c0_27 = arith.constant 0 : index
      %c2_28 = arith.constant 2 : index
      %50 = vector.load %arg7[%c0_27, %c2_28] : memref<8x4xf32, #tpu.memory_space<vmem>>, vector<8x1xf32>
      tpu.vector_store %arg7[%c0_27, %c2_28], %44 {strides = array<i32>} : memref<8x4xf32, #tpu.memory_space<vmem>>, vector<8x1xf32>,
      %c0_29 = arith.constant 0 : index
      %c3_30 = arith.constant 3 : index
      %51 = vector.load %arg7[%c0_29, %c3_30] : memref<8x4xf32, #tpu.memory_space<vmem>>, vector<8x1xf32>
      tpu.vector_store %arg7[%c0_29, %c3_30], %47 {strides = array<i32>} : memref<8x4xf32, #tpu.memory_space<vmem>>, vector<8x1xf32>,
    } else {
    }
    return
  }
  func.func @transform_0(%arg0: i32, %arg1: i32) -> (i32, i32, i32) {
    %c0_i32 = arith.constant 0 : i32
    %c0_i32_0 = arith.constant 0 : i32
    %c0_i32_1 = arith.constant 0 : i32
    return %c0_i32, %c0_i32_0, %arg1 : i32, i32, i32
  }
  func.func @transform_1(%arg0: i32, %arg1: i32) -> (i32, i32) {
    %c0_i32 = arith.constant 0 : i32
    %c0_i32_0 = arith.constant 0 : i32
    %c0_i32_1 = arith.constant 0 : i32
    return %c0_i32, %c0_i32_0 : i32, i32
  }
  func.func @transform_2(%arg0: i32, %arg1: i32) -> (i32, i32) {
    %c0_i32 = arith.constant 0 : i32
    %c0_i32_0 = arith.constant 0 : i32
    %c0_i32_1 = arith.constant 0 : i32
    return %c0_i32, %c0_i32_0 : i32, i32
  }
  func.func @transform_3(%arg0: i32, %arg1: i32) -> (i32, i32) {
    %c0_i32 = arith.constant 0 : i32
    %c0_i32_0 = arith.constant 0 : i32
    %c0_i32_1 = arith.constant 0 : i32
    return %c0_i32, %c0_i32_0 : i32, i32
  }
  func.func @transform_4(%arg0: i32, %arg1: i32) -> (i32, i32) {
    %c0_i32 = arith.constant 0 : i32
    %c0_i32_0 = arith.constant 0 : i32
    %c0_i32_1 = arith.constant 0 : i32
    return %c0_i32, %c0_i32_0 : i32, i32
  }
  func.func @transform_5(%arg0: i32, %arg1: i32) -> (i32, i32) {
    %c0_i32 = arith.constant 0 : i32
    %c0_i32_0 = arith.constant 0 : i32
    %c0_i32_1 = arith.constant 0 : i32
    return %c0_i32, %c0_i32_0 : i32, i32
  }
}

</mosaic_0001>

<bundles_post_ra>
// kernel: tpu_custom_call.1
= control target key start
LH: loop header
LB: loop body
LE: loop exit
PB: predicated region body
PF: predicated region fallthrough
CT: control target
= control target key end

     0   :  { %10 = vsyncpa [#allocation7], 0  ;;  %s1786_s0 = inlined_call_operand.hbm [shape: bf16[3,16,768], index: 0, kind: input, shape index: {}]   ;;  %s1787_s1 = inlined_call_operand.vmem [shape: bf16[8,16], index: 1, kind: input, shape index: {}]   ;;  %s1788_s2 = inlined_call_operand.vmem [shape: bf16[8,8], index: 2, kind: input, shape index: {}]   ;;  %s1789_s3 = inlined_call_operand.vmem [shape: f32[8,4], index: 3, kind: input, shape index: {}]   ;;  %s1790_s4 = inlined_call_operand.vmem [shape: f32[1,2], index: 4, kind: input, shape index: {}]   ;;  %s1791_s5 = inlined_call_operand.vmem [shape: f32[8,4], index: 5, kind: output, shape index: {}]  }
   0x1   :  { %12 = vsyncpa [#allocation7 + $0x1], 0  ;;  %s1494_s18 = smov 0   ;;  %s1496_s19 = smov 0  }
   0x2   :  { %s1498_s20 = smov 0   ;;  %s1500_s21 = smov 0  }
   0x3   :  { %s1502_s22 = smov 0   ;;  %s1504_s23 = smov 0  }
   0x4   :  { %s1506_s24 = smov 0   ;;  %s1508_s25 = smov 0  }
   0x5 LB: > { %s1118_s26 = sadd.s32 4294967295, %s1451_s25   ;;  %s27_s27 = sadd.s32 1, %s1443_s23  ;;  %s1451_s25 = sphi %s1508_s25, %s18_s25   ;;  %s1447_s24 = sphi %s1506_s24, %s1801_s24   ;;  %s1443_s23 = sphi %s1504_s23, %s1800_s23   ;;  %s1439_s22 = sphi %s1502_s22, %s1799_s22   ;;  %s1435_s21 = sphi %s1500_s21, %s1798_s21   ;;  %s1431_s20 = sphi %s1498_s20, %s1797_s20   ;;  %s1427_s19 = sphi %s1496_s19, %s1796_s19   ;;  %s1423_s18 = sphi %s1494_s18, %s1795_s18  }
   0x6   : > { %p28_p0 = scmp.ge.s32.totalorder %s27_s27, 2  ;;  %s30_s28 = sadd.s32 1, %s1447_s24 }
   0x7   : > { %s37_s29 = sadd.s32 1, %s1431_s20  ;;  %p44_p1 = scmp.ne.s32.totalorder %s1431_s20, %s1427_s19 }
   0x8   : > { %s1803_s27 = smov (%p28_p0, %s27_s27), 0  ;;  %s1805_s28 = smov (!%p28_p0, %s30_s28), %s1447_s24 }
   0x9   : > { %s34_s30 = ssub.s32 %s1443_s23, %s1803_s27  ;;  %p45_p2 = scmp.eq.s32.totalorder %s1451_s25, 0 }
   0xa   : > { %p32_p3 = scmp.ge.s32.totalorder %s1805_s28, 2  ;;  %p35_p4 = scmp.eq.s32.totalorder %s34_s30, 0 }
   0xb   : > { %p46_p5 = por %p45_p2, %p44_p1  ;;  %p50_p6 = scmp.ne.s32.totalorder %s1427_s19, %s1423_s18 }
   0xc   : > { %s1807_s28 = smov (%p32_p3, %s1805_s28), 0  ;;  %p51_p7 = scmp.eq.s32.totalorder %s1118_s26, 0 }
   0xd   : > { %1792 = sst [smem:[#allocation9_spill]] %s1807_s28  ;;  %p1269_p8 = scmp.lt.s32.totalorder %s1451_s25, 4 }
   0xe   : > { %s1548_s6 = scalar_select %p35_p4, %s1431_s20, %s37_s29  }
   0xf   : > { %s191_s7 = sand.u32 1, %s1431_s20   ;;  %p1552_p9 = por %p51_p7, %p50_p6 }
  0x10   : > { %s1261_s9 = smul.u32 72, %s191_s7  ;;  %p1266_p10 = pnand %p1269_p8, %p46_p5 }
  0x11   : > { %s1242_s10 = smul.u32 12, %s1443_s23  ;;  %p1122_p11 = scmp.ge.s32.totalorder %s1451_s25, 1 }
  0x12   : > { %s195_s14 = scalar_lea.vmem [#allocation6], %s1261_s9  ;;  %s192_s17 = scalar_lea.sflag [#allocation7], %s191_s7 }
  0x13   : > { %s200_s13 = scalar_lea.hbm %s1786_s0, %s1242_s10  ;;  %s203_s15 = sshll.u32 %s195_s14, 4  ;;  %s204_s15 = int_to_ptr.vmem [resolvable:$true] %s203_s15 }
  0x14   : > { %s201_s16 = sshll.u32 %s200_s13, 4  ;;  %s1453_s18 = smov 384   ;;  %s202_s16 = int_to_ptr.hbm [resolvable:$true] %s201_s16 }
  0x15   : > { %s1454_s26 = smov 192   ;;  %s1455_s29 = smov 12  }
  0x16   : > { %1268 = dma.hbm_to_vmem [thread:$0]  (!%p1266_p10), %s202_s16, 1152, %s204_s15, %s192_s17, %s1453_s18, %s1454_s26, %s1455_s29  }
  0x17   : > { %p211_p12 = scmp.lt.s32.totalorder %s1451_s25, 5 }
  0x19   : > { %p212_p13 = pnand %p1122_p11, %p211_p12 }
  0x1a   : > { %s217_s30 = sand.u32 (!%p212_p13), 1, %s1427_s19  }
  0x1b   : > { %215 = sbr.rel (%p212_p13) target bundleno = 1601 (0x641), region = 40  ;;  %s218_s11 = scalar_lea.sflag (!%p212_p13), [#allocation7], %s217_s30 }
  0x1c   : > { %s1262_s28 = smul.u32 (!%p212_p13), 72, %s217_s30 }
  0x1e   : > { %s1563_s10 = scalar_lea.vmem (!%p212_p13), [#allocation6], %s1262_s28 }
  0x20   : > { %1418 = dma.done.wait (%p1552_p9), %s218_s11, 1152  }
  0x21   : > { %1420 = vsyncadd (%p1552_p9), %s218_s11, 4294966144  ;;  %p246_p0 = scmp.eq.s32.totalorder %s1439_s22, 0  ;;  %p247_p1 = scmp.eq.s32.totalorder %s1435_s21, 0 }
  0x23   : > { %p248_p2 = pnand %p247_p1, %p246_p0 }
  0x25   : > { %251 = sbr.rel (%p248_p2) target bundleno = 47 (0x2f), region = 48 }
  0x2a   : > { %vm252_vm0 = vcmask 7168   ;;  %v1456_v0 = vmov 0.0  }
  0x2b   : > { %253 = vst.msk [vmem:[#allocation2] sm:$0xff] %vm252_vm0, %v1456_v0 }
  0x2c   : > { %254 = vst.msk [vmem:[#allocation3] sm:$0xff] %vm252_vm0, %v1456_v0 }
  0x2d   : > { %255 = vst.msk [vmem:[#allocation4] sm:$0xff] %vm252_vm0, %v1456_v0 }
  0x2e   : > { %256 = vst.msk [vmem:[#allocation5] sm:$0xff] %vm252_vm0, %v1456_v0 }
  0x2f PF: > { %p1123_p3 = scmp.ne.s32.totalorder %s1439_s22, 0 }
  0x31   : > { %259 = sbr.rel (%p1123_p3) target bundleno = 349 (0x15d), region = 52 }
  0x36   : > { %v1126_v1 = vld [vmem:[%s1563_s10] sm:$0xf]  ;;  %v1244_v2 = vld [vmem:[%s1563_s10 + $0x8] sm:$0xf0]  ;;  %v1243_v3 = vld [vmem:[%s1563_s10 + $0x4] sm:$0xf] }
  0x37   : > { %v1127_v4 = vor.u32 %v1244_v2, %v1126_v1  ;;  %v1128_v5 = vld [vmem:[%s1563_s10 + $0xc] sm:$0xf0]  ;;  %v1134_v6 = vld [vmem:[%s1563_s10 + $0x8] sm:$0xf]  ;;  %v1245_v7 = vld [vmem:[%s1563_s10 + $0x10] sm:$0xf0] }
  0x38   : > { %v1131_v8 = vor.u32 %v1243_v3, %v1128_v5  ;;  %v1135_v9 = vor.u32 %v1245_v7, %v1134_v6  ;;  %v1145_v10 = vld [vmem:[%s1563_s10 + $0x18] sm:$0xf]  ;;  %v1247_v11 = vld [vmem:[%s1563_s10 + $0x20] sm:$0xf0]  ;;  %vm281_vm1 = vcmask 130048   ;;  %vm485_vm2 = vcmask 7168  }
  0x39   : > { %v260_v12 = vld [vmem:[%s1787_s1] sm:$0xf]  ;;  %292 = vmatpush.bf16.msra.mxu0 %v1127_v4  ;;  %v1146_v13 = vor.u32 %v1247_v11, %v1145_v10  ;;  %v1246_v14 = vld [vmem:[%s1563_s10 + $0x1c] sm:$0xf]  ;;  %v1147_v15 = vld [vmem:[%s1563_s10 + $0x24] sm:$0xf0] }
  0x3a   : > { %305 = vmatpush.bf16.msra.mxu1 %v1131_v8  ;;  %318 = vmatpush.bf16.msra.mxu2 %v1135_v9  ;;  %v1150_v16 = vor.u32 %v1246_v14, %v1147_v15  ;;  %v1164_v17 = vld [vmem:[%s1563_s10 + $0x30] sm:$0xf]  ;;  %v1250_v18 = vld [vmem:[%s1563_s10 + $0x38] sm:$0xf0]  ;;  %v1249_v19 = vld [vmem:[%s1563_s10 + $0x34] sm:$0xf] }
  0x3b   : > { %365 = vmatpush.bf16.msra.mxu3 %v1146_v13  ;;  %v1165_v20 = vor.u32 %v1250_v18, %v1164_v17  ;;  %v1166_v21 = vld [vmem:[%s1563_s10 + $0x3c] sm:$0xf0]  ;;  %v1248_v23 = vld [vmem:[%s1563_s10 + $0x28] sm:$0xf0]  ;;  %v1172_v26 = vld [vmem:[%s1563_s10 + $0x38] sm:$0xf] }
  0x3c   : > { %v1153_v22 = vld [vmem:[%s1563_s10 + $0x20] sm:$0xf]  ;;  %1136 = vmatmul.msk.bf16.vlgmr.msra.gmra.mxu0 %vm281_vm1, %v260_v12  ;;  %v1169_v24 = vor.u32 %v1249_v19, %v1166_v21  ;;  %v1251_v27 = vld [vmem:[%s1563_s10 + $0x40] sm:$0xf0] }
  0x3d   : > { %v1154_v25 = vor.u32 %v1248_v23, %v1153_v22  ;;  %1137 = vmatmul.msk.bf16.vlgmr.msra.gmra.mxu1 %vm281_vm1, %v260_v12  ;;  %1138 = vmatmul.msk.bf16.vlgmr.msra.gmra.mxu2 %vm281_vm1, %v260_v12  ;;  %v1173_v28 = vor.u32 %v1251_v27, %v1172_v26  ;;  %v483_v7 = vld [vmem:[#allocation2] sm:$0xff]  ;;  %v487_v14 = vld [vmem:[#allocation3] sm:$0xff] }
  0x3e   : > { %1155 = vmatmul.msk.bf16.vlgmr.msra.gmra.mxu3 %vm281_vm1, %v260_v12  ;;  %378 = vmatpush.bf16.msrb.mxu0 %v1150_v16 }
  0x3f   : > { %438 = vmatpush.bf16.msrb.mxu2 %v1165_v20  ;;  %451 = vmatpush.bf16.msrb.mxu3 %v1169_v24 }
  0x40   : > { %391 = vmatpush.bf16.msrb.mxu1 %v1154_v25 }
  0x42   : > { %464 = vmatpush.bf16.msra.mxu0 %v1173_v28 }
  0x4c   : > { %1156 = vmatmul.msk.bf16.vlgmr.msrb.gmra.mxu0 %vm281_vm1, %v260_v12 }
  0x4d   : > { %1174 = vmatmul.msk.bf16.vlgmr.msrb.gmra.mxu2 %vm281_vm1, %v260_v12  ;;  %1157 = vmatmul.msk.bf16.vlgmr.msrb.gmra.mxu1 %vm281_vm1, %v260_v12 }
  0x4e   : > { %1175 = vmatmul.msk.bf16.vlgmr.msrb.gmra.mxu3 %vm281_vm1, %v260_v12 }
  0x5c   : > { %1176 = vmatmul.msk.bf16.vlgmr.msra.gmra.mxu0 %vm281_vm1, %v260_v12 }
  0xb9   : > { %v294_v29 = vpop.f32.mrf.mxu0 }
  0xba   : > { %v307_v30 = vpop.f32.mrf.mxu1  ;;  %v329_v37 = vmul.f32 %v294_v29, %v294_v29 }
  0xbb   : > { %v324_v31 = vadd.f32 %v307_v30, %v294_v29  ;;  %v330_v38 = vmul.f32 %v307_v30, %v307_v30 }
  0xbd   : > { %v332_v40 = vadd.f32 %v330_v38, %v329_v37 }
  0xc0   : > { %v320_v32 = vpop.f32.mrf.mxu2 }
  0xc1   : > { %v367_v33 = vpop.f32.mrf.mxu3  ;;  %v296_v34 = vpop.f32.mrf.mxu0  ;;  %v325_v35 = vadd.f32 %v324_v31, %v320_v32  ;;  %v331_v39 = vmul.f32 %v320_v32, %v320_v32 }
  0xc2   : > { %v309_v36 = vpop.f32.mrf.mxu1  ;;  %v402_v49 = vmul.f32 %v367_v33, %v367_v33 }
  0xc3   : > { %326 = vadd.xlane.f32.xlu0 %v325_v35  ;;  %v333_v44 = vadd.f32 %v332_v40, %v331_v39 }
  0xc8   : > { %v322_v41 = vpop.f32.mrf.mxu2 }
  0xc9   : > { %v369_v42 = vpop.f32.mrf.mxu3  ;;  %v380_v43 = vpop.f32.mrf.mxu0 }
  0xca   : > { %v397_v45 = vadd.f32 %v380_v43, %v367_v33  ;;  %v393_v46 = vpop.f32.mrf.mxu1  ;;  %v403_v47 = vmul.f32 %v380_v43, %v380_v43 }
  0xcb   : > { %334 = vadd.xlane.f32.xlu0 %v333_v44  ;;  %v404_v50 = vmul.f32 %v393_v46, %v393_v46 }
  0xcc   : > { %v398_v48 = vadd.f32 %v397_v45, %v393_v46  ;;  %v405_v52 = vadd.f32 %v403_v47, %v402_v49 }
  0xce   : > { %399 = vadd.xlane.f32.xlu1 %v398_v48  ;;  %v406_v56 = vadd.f32 %v405_v52, %v404_v50 }
  0xd0   : > { %v440_v51 = vpop.f32.mrf.mxu2 }
  0xd1   : > { %v453_v53 = vpop.f32.mrf.mxu3  ;;  %v382_v54 = vpop.f32.mrf.mxu0  ;;  %v475_v61 = vmul.f32 %v440_v51, %v440_v51 }
  0xd2   : > { %v395_v55 = vpop.f32.mrf.mxu1  ;;  %v470_v57 = vadd.f32 %v453_v53, %v440_v51  ;;  %v476_v62 = vmul.f32 %v453_v53, %v453_v53 }
  0xd4   : > { %v478_v1 = vadd.f32 %v476_v62, %v475_v61 }
  0xd6   : > { %407 = vadd.xlane.f32.xlu1 %v406_v56 }
  0xd8   : > { %v442_v58 = vpop.f32.mrf.mxu2 }
  0xd9   : > { %v455_v59 = vpop.f32.mrf.mxu3  ;;  %v466_v60 = vpop.f32.mrf.mxu0 }
  0xda   : > { %v471_v63 = vadd.f32 %v470_v57, %v466_v60  ;;  %v477_v0 = vmul.f32 %v466_v60, %v466_v60 }
  0xdc   : > { %472 = vadd.xlane.f32.xlu2 %v471_v63  ;;  %v479_v3 = vadd.f32 %v478_v1, %v477_v0 }
  0xe1   : > { %v468_v2 = vpop.f32.mrf.mxu0 }
  0xe4   : > { %480 = vadd.xlane.f32.xlu2 %v479_v3 }
 0x136   : > { %v327_v5 = vpop.xlane.xlu0 %326 }
 0x13e   : > { %v335_v12 = vpop.xlane.xlu0 %334 }
 0x141   : > { %v400_v4 = vpop.xlane.xlu1 %399 }
 0x142   : > { %v401_v6 = vadd.f32 %v400_v4, %v327_v5 }
 0x149   : > { %v408_v11 = vpop.xlane.xlu1 %407 }
 0x14a   : > { %v409_v13 = vadd.f32 %v408_v11, %v335_v12 }
 0x14f   : > { %v473_v8 = vpop.xlane.xlu2 %472 }
 0x150   : > { %v474_v9 = vadd.f32 %v473_v8, %v401_v6 }
 0x152   : > { %v484_v10 = vadd.f32 %v483_v7, %v474_v9 }
 0x154   : > { %486 = vst.msk [vmem:[#allocation2] sm:$0xff] %vm485_vm2, %v484_v10 }
 0x157   : > { %v481_v15 = vpop.xlane.xlu2 %480 }
 0x158   : > { %v482_v16 = vadd.f32 %v481_v15, %v409_v13 }
 0x15a   : > { %v488_v17 = vadd.f32 %v487_v14, %v482_v16 }
 0x15c   : > { %489 = vst.msk [vmem:[#allocation3] sm:$0xff] %vm485_vm2, %v488_v17 }
 0x15d PF: > { %p490_p4 = scmp.eq.s32.totalorder %s1439_s22, 1  ;;  %p1177_p5 = scmp.ne.s32.totalorder %s1439_s22, 1 }
 0x15e   : > { %s1458_s14 = smov (!%p1177_p5), 1   ;;  %s615_s17 = smul.u32 (!%p1177_p5), 384, %s1435_s21 }
 0x15f   : > { %493 = sbr.rel (%p1177_p5) target bundleno = 1213 (0x4bd), region = 56 }
 0x164   : > { %v494_v18 = vld [vmem:[#allocation2] sm:$0xff]  ;;  %v496_v19 = vld [vmem:[#allocation3] sm:$0xff]  ;;  %v1457_v23 = vmov 0   ;;  %v1254_v24 = vld [vmem:[%s1563_s10 + $0x10] sm:$0xf0]  ;;  %vm541_vm3 = vcmask 130048   ;;  %v616_v61 = vlaneseq  ;;  %v620_v1 = vstv %s615_s17 }
 0x165   : > { %v495_v20 = vmul.f32 0.00055555557, %v494_v18  ;;  %v497_v21 = vmul.f32 0.00055555557, %v496_v19  ;;  %v1188_v22 = vld [vmem:[%s1563_s10 + $0x8] sm:$0xf]  ;;  %1345 = vset.pattern.permute.xlu0 %v1457_v23 }
 0x166   : > { %v1202_v25 = vld [vmem:[%s1563_s10 + $0x18] sm:$0xf]  ;;  %v1189_v27 = vor.u32 %v1254_v24, %v1188_v22  ;;  %v1256_v28 = vld [vmem:[%s1563_s10 + $0x20] sm:$0xf0]  ;;  %v1180_v29 = vld [vmem:[%s1563_s10] sm:$0xf] }
 0x167   : > { %v498_v26 = vmul.f32 %v495_v20, %v495_v20  ;;  %v1253_v30 = vld [vmem:[%s1563_s10 + $0x8] sm:$0xf0]  ;;  %v1203_v31 = vor.u32 %v1256_v28, %v1202_v25  ;;  %v1252_v33 = vld [vmem:[%s1563_s10 + $0x4] sm:$0xf]  ;;  %v1182_v34 = vld [vmem:[%s1563_s10 + $0xc] sm:$0xf0] }
 0x168   : > { %v1181_v32 = vor.u32 %v1253_v30, %v1180_v29  ;;  %578 = vmatpush.bf16.msra.mxu2 %v1189_v27  ;;  %v1615_v36 = vld [vmem:[%s1787_s1] sm:$0xf]  ;;  %v1185_v37 = vor.u32 %v1252_v33, %v1182_v34  ;;  %v1459_v49 = vmov 1   ;;  %v617_v62 = vand.u32 127, %v616_v61  ;;  %v1255_v11 = vld [vmem:[%s1563_s10 + $0x1c] sm:$0xf] }
 0x169   : > { %v499_v35 = vsub.f32 %v497_v21, %v498_v26  ;;  %v500_v44 = vld [vmem:[%s1789_s3] sm:$0xff]  ;;  %1346 = vset.pattern.permute.xlu1 %v1459_v49  ;;  %v1204_v12 = vld [vmem:[%s1563_s10 + $0x24] sm:$0xf0]  ;;  %vm644_vm8 = vcmask 1043456   ;;  %v1257_v28 = vld [vmem:[%s1563_s10 + $0x28] sm:$0xf0] }
 0x16a   : > { %552 = vmatpush.bf16.msra.mxu0 %v1181_v32  ;;  %565 = vmatpush.bf16.msra.mxu1 %v1185_v37  ;;  %v1348_v58 = vld [vmem:[%s1790_s4] ss:$0 sm:$0xff]  ;;  %v618_v2 = vadd.s32 128, %v617_v62  ;;  %v619_v3 = vadd.s32 256, %v617_v62  ;;  %v1640_v8 = vadd.s32 %v620_v1, %v617_v62  ;;  %v1207_v18 = vor.u32 %v1255_v11, %v1204_v12 }
 0x16b   : > { %v501_v38 = vadd.f32 1e-05, %v499_v35  ;;  %1192 = vmatmul.msk.bf16.vlgmr.msra.gmra.mxu2 %vm541_vm3, %v1615_v36  ;;  %v1210_v27 = vld [vmem:[%s1563_s10 + $0x20] sm:$0xf]  ;;  %vm640_vm15 = vcmask 64512  }
 0x16c   : > { %734 = vmatpush.bf16.msrb.mxu2 %v1203_v31  ;;  %v1642_v9 = vadd.s32 %v620_v1, %v618_v2  ;;  %v1644_v10 = vadd.s32 %v620_v1, %v619_v3  ;;  %vm624_vm7 = vcmp.lt.s32.totalorder %v1640_v8, 600 }
 0x16d   : > { %1349 = vrsqrt.f32 %v501_v38  ;;  %1190 = vmatmul.msk.bf16.vlgmr.msra.gmra.mxu0 %vm541_vm3, %v1615_v36  ;;  %1191 = vmatmul.msk.bf16.vlgmr.msra.gmra.mxu1 %vm541_vm3, %v1615_v36  ;;  %vm508_vm4 = vweird.f32 %v501_v38 }
 0x16e   : > { %vm625_vm9 = vcmp.lt.s32.totalorder %v1642_v9, 600  ;;  %vm626_vm10 = vcmp.lt.s32.totalorder %v1644_v10, 600 }
 0x173   : > { %v1350_v39 = vpop.eup %1349 }
 0x174   : > { %v503_v40 = vmul.f32 %v1350_v39, %v501_v38  ;;  %vm509_vm5 = vweird.f32 %v1350_v39  ;;  %v1224_v38 = vld [vmem:[%s1563_s10 + $0x30] sm:$0xf] }
 0x175   : > { %vm510_vm6 = vmor %vm508_vm4, %vm509_vm5 }
 0x176   : > { %v504_v41 = vmul.f32 %v1350_v39, %v503_v40  ;;  %v1211_v40 = vor.u32 %v1257_v28, %v1210_v27 }
 0x178   : > { %v505_v42 = vmul.f32 0.5, %v504_v41  ;;  %v1258_v41 = vld [vmem:[%s1563_s10 + $0x34] sm:$0xf] }
 0x17a   : > { %v506_v43 = vsub.f32 1.5, %v505_v42  ;;  %v1226_v42 = vld [vmem:[%s1563_s10 + $0x3c] sm:$0xf0] }
 0x17b   : > { %1212 = vmatmul.msk.bf16.vlgmr.msrb.gmra.mxu2 %vm541_vm3, %v1615_v36  ;;  %v1229_v49 = vor.u32 %v1258_v41, %v1226_v42 }
 0x17c   : > { %v507_v45 = vmul.f32 %v1350_v39, %v506_v43 }
 0x17e   : > { %v511_v46 = vsel %vm510_vm6, %v1350_v39, %v507_v45  ;;  %v1259_v39 = vld [vmem:[%s1563_s10 + $0x38] sm:$0xf0] }
 0x17f   : > { %v512_v47 = vmul.f32 %v511_v46, %v500_v44 }
 0x181   : > { %v513_v48 = vmul.f32 %v512_v47, %v495_v20 }
 0x183   : > { %515 = vrot.lane.b32.xlu0 %v513_v48, %s1458_s14  ;;  %v1225_v48 = vor.u32 %v1259_v39, %v1224_v38 }
 0x18b   : > { %586 = vperm.xlu0 %1345, %v512_v47   ;;  %v1682_v47 = vld [vmem:[%s1788_s2] sm:$0xf] }
 0x1ea   : > { %v554_v50 = vpop.f32.mrf.mxu0  ;;  %v567_v51 = vpop.f32.mrf.mxu1 }
 0x1ee   : > { %v580_v52 = vpop.f32.mrf.mxu2 }
 0x1f2   : > { %v556_v53 = vpop.f32.mrf.mxu0  ;;  %v569_v54 = vpop.f32.mrf.mxu1 }
 0x1f5   : > { %v516_v55 = vpop.permute.xlu0 %515 }
 0x1f6   : > { %v518_v56 = vsub.f32 %v500_v44, %v516_v55  ;;  %v582_v57 = vpop.f32.mrf.mxu2 }
 0x1f8   : > { %594 = vperm.xlu1 %1346, %v518_v56  }
 0x1fd   : > { %v1632_v63 = vpop.permute.xlu0 %586 }
 0x1fe   : > { %v736_v59 = vpop.f32.mrf.mxu2  ;;  %v589_v4 = vmul.f32 %v1632_v63, %v554_v50  ;;  %v590_v5 = vmul.f32 %v1632_v63, %v567_v51  ;;  %v591_v6 = vmul.f32 %v1632_v63, %v580_v52 }
 0x1ff   : > { %v766_v7 = vmul.f32 %v736_v59, %v1632_v63 }
 0x200   : > { %1347 = vset.pattern.permute.xlu1 %v1457_v23 }
 0x201   : > { %606 = vperm.xlu1 %1347, %v1348_v58  }
 0x206   : > { %v738_v60 = vpop.f32.mrf.mxu2 }
 0x26a   : > { %v1634_v0 = vpop.permute.xlu1 %594 }
 0x26b   : > { %v597_v13 = vadd.f32 %v1634_v0, %v589_v4  ;;  %v598_v14 = vadd.f32 %v1634_v0, %v590_v5  ;;  %v599_v15 = vadd.f32 %v1634_v0, %v591_v6  ;;  %v769_v16 = vadd.f32 %v766_v7, %v1634_v0 }
 0x26d   : > { %vm600_vm11 = vcmp.gt.f32.partialorder %v597_v13, 0.0  ;;  %vm601_vm12 = vcmp.gt.f32.partialorder %v598_v14, 0.0  ;;  %vm602_vm13 = vcmp.gt.f32.partialorder %v599_v15, 0.0  ;;  %vm772_vm14 = vcmp.gt.f32.partialorder %v769_v16, 0.0 }
 0x273   : > { %v1653_v17 = vpop.permute.xlu1 %606 }
 0x274   : > { %v609_v19 = vmul.f32 %v1653_v17, %v597_v13  ;;  %v610_v20 = vmul.f32 %v1653_v17, %v598_v14  ;;  %v611_v21 = vmul.f32 %v1653_v17, %v599_v15  ;;  %v775_v22 = vmul.f32 %v769_v16, %v1653_v17 }
 0x276   : > { %v612_v23 = vsel %vm600_vm11, %v597_v13, %v609_v19  ;;  %v613_v24 = vsel %vm601_vm12, %v598_v14, %v610_v20  ;;  %v614_v25 = vsel %vm602_vm13, %v599_v15, %v611_v21  ;;  %v778_v26 = vsel %vm772_vm14, %v769_v16, %v775_v22  ;;  %v1232_v20 = vld [vmem:[%s1563_s10 + $0x38] sm:$0xf]  ;;  %v1260_v21 = vld [vmem:[%s1563_s10 + $0x40] sm:$0xf0] }
 0x277   : > { %v633_v29 = vsel %vm624_vm7, %v612_v23, 0.0  ;;  %v634_v30 = vsel %vm625_vm9, %v613_v24, 0.0  ;;  %v635_v31 = vsel %vm626_vm10, %v614_v25, 0.0  ;;  %v781_v32 = vsel %vm624_vm7, %v778_v26, 0.0 }
 0x278   : > { %v637_v33 = vpack.c.bf16 %v633_v29, %v633_v29  ;;  %v638_v34 = vpack.c.bf16 %v634_v30, %v634_v30  ;;  %v639_v35 = vpack.c.bf16 %v635_v31, %v635_v31  ;;  %v784_v37 = vpack.c.bf16 %v781_v32, %v781_v32 }
 0x279   : > { %v1233_v26 = vor.u32 %v1260_v21, %v1232_v20  ;;  %v990_v20 = vld [vmem:[#allocation4] sm:$0xff] }
 0x27a   : > { %v646_v43 = vsel %vm644_vm8, %v637_v33, 0  ;;  %v649_v44 = vsel %vm644_vm8, %v638_v34, 0  ;;  %v652_v45 = vsel %vm644_vm8, %v639_v35, 0  ;;  %v788_v46 = vsel %vm644_vm8, %v784_v37, 0 }
 0x27b   : > { %661 = vmatpush.bf16.msra.mxu3 %v646_v43  ;;  %674 = vmatpush.bf16.msrb.mxu0 %v649_v44 }
 0x27c   : > { %687 = vmatpush.bf16.msrb.mxu1 %v652_v45 }
 0x27e   : > { %1193 = vmatmul.msk.bf16.vlgmr.msra.gmra.mxu3 %vm640_vm15, %v1682_v47  ;;  %1194 = vmatmul.msk.bf16.vlgmr.msrb.gmra.mxu0 %vm640_vm15, %v1682_v47 }
 0x27f   : > { %747 = vmatpush.bf16.msrb.mxu3 %v1207_v18  ;;  %760 = vmatpush.bf16.msra.mxu0 %v1211_v40 }
 0x280   : > { %803 = vmatpush.bf16.msra.mxu1 %v788_v46 }
 0x281   : > { %1195 = vmatmul.msk.bf16.vlgmr.msrb.gmra.mxu1 %vm640_vm15, %v1682_v47 }
 0x283   : > { %876 = vmatpush.bf16.msrb.mxu0 %v1225_v48 }
 0x284   : > { %889 = vmatpush.bf16.msrb.mxu1 %v1229_v49 }
 0x28e   : > { %1213 = vmatmul.msk.bf16.vlgmr.msrb.gmra.mxu3 %vm541_vm3, %v1615_v36  ;;  %1214 = vmatmul.msk.bf16.vlgmr.msra.gmra.mxu0 %vm541_vm3, %v1615_v36 }
 0x291   : > { %1215 = vmatmul.msk.bf16.vlgmr.msra.gmra.mxu1 %vm640_vm15, %v1682_v47 }
 0x29e   : > { %1234 = vmatmul.msk.bf16.vlgmr.msrb.gmra.mxu0 %vm541_vm3, %v1615_v36 }
 0x2a1   : > { %1235 = vmatmul.msk.bf16.vlgmr.msrb.gmra.mxu1 %vm541_vm3, %v1615_v36 }
 0x2fb   : > { %v676_v50 = vpop.f32.mrf.mxu0 }
 0x2fc   : > { %v699_v55 = vmul.f32 %v676_v50, %v676_v50 }
 0x2fe   : > { %v689_v51 = vpop.f32.mrf.mxu1 }
 0x2ff   : > { %v700_v59 = vmul.f32 %v689_v51, %v689_v51 }
 0x301   : > { %v663_v52 = vpop.f32.mrf.mxu3 }
 0x302   : > { %v693_v53 = vadd.f32 %v676_v50, %v663_v52  ;;  %v698_v56 = vmul.f32 %v663_v52, %v663_v52 }
 0x303   : > { %v678_v54 = vpop.f32.mrf.mxu0 }
 0x304   : > { %v694_v58 = vadd.f32 %v693_v53, %v689_v51  ;;  %v701_v60 = vadd.f32 %v699_v55, %v698_v56 }
 0x306   : > { %v691_v57 = vpop.f32.mrf.mxu1  ;;  %695 = vadd.xlane.f32.xlu2 %v694_v58  ;;  %v702_v3 = vadd.f32 %v701_v60, %v700_v59 }
 0x309   : > { %v665_v61 = vpop.f32.mrf.mxu3 }
 0x30b   : > { %v762_v62 = vpop.f32.mrf.mxu0 }
 0x30c   : > { %v768_v1 = vmul.f32 %v762_v62, %v1632_v63 }
 0x30e   : > { %v805_v2 = vpop.f32.mrf.mxu1  ;;  %v771_v4 = vadd.f32 %v768_v1, %v1634_v0  ;;  %703 = vadd.xlane.f32.xlu2 %v702_v3 }
 0x30f   : > { %v840_v48 = vmul.f32 %v805_v2, %v805_v2 }
 0x310   : > { %vm774_vm0 = vcmp.gt.f32.partialorder %v771_v4, 0.0  ;;  %v777_v5 = vmul.f32 %v771_v4, %v1653_v17 }
 0x311   : > { %v749_v6 = vpop.f32.mrf.mxu3 }
 0x312   : > { %v767_v7 = vmul.f32 %v749_v6, %v1632_v63  ;;  %v780_v11 = vsel %vm774_vm0, %v771_v4, %v777_v5 }
 0x313   : > { %v764_v12 = vpop.f32.mrf.mxu0  ;;  %v783_v13 = vsel %vm626_vm10, %v780_v11, 0.0 }
 0x314   : > { %v770_v14 = vadd.f32 %v767_v7, %v1634_v0  ;;  %v786_v16 = vpack.c.bf16 %v783_v13, %v783_v13 }
 0x316   : > { %v807_v15 = vpop.f32.mrf.mxu1  ;;  %vm773_vm1 = vcmp.gt.f32.partialorder %v770_v14, 0.0  ;;  %v776_v18 = vmul.f32 %v770_v14, %v1653_v17  ;;  %v794_v19 = vsel %vm644_vm8, %v786_v16, 0 }
 0x317   : > { %829 = vmatpush.bf16.msra.mxu3 %v794_v19 }
 0x318   : > { %v779_v22 = vsel %vm773_vm1, %v770_v14, %v776_v18 }
 0x319   : > { %v751_v23 = vpop.f32.mrf.mxu3  ;;  %v782_v24 = vsel %vm625_vm9, %v779_v22, 0.0 }
 0x31a   : > { %v785_v25 = vpack.c.bf16 %v782_v24, %v782_v24  ;;  %1217 = vmatmul.msk.bf16.vlgmr.msra.gmra.mxu3 %vm640_vm15, %v1682_v47  ;;  %v994_v24 = vld [vmem:[#allocation5] sm:$0xff] }
 0x31b   : > { %v878_v27 = vpop.f32.mrf.mxu0 }
 0x31c   : > { %v908_v28 = vmul.f32 %v878_v27, %v1632_v63  ;;  %v791_v30 = vsel %vm644_vm8, %v785_v25, 0 }
 0x31d   : > { %816 = vmatpush.bf16.msra.mxu2 %v791_v30 }
 0x31e   : > { %v891_v29 = vpop.f32.mrf.mxu1  ;;  %v911_v32 = vadd.f32 %v908_v28, %v1634_v0 }
 0x31f   : > { %v909_v31 = vmul.f32 %v891_v29, %v1632_v63 }
 0x320   : > { %vm914_vm2 = vcmp.gt.f32.partialorder %v911_v32, 0.0  ;;  %v917_v34 = vmul.f32 %v911_v32, %v1653_v17  ;;  %1216 = vmatmul.msk.bf16.vlgmr.msra.gmra.mxu2 %vm640_vm15, %v1682_v47 }
 0x321   : > { %902 = vmatpush.bf16.msrb.mxu2 %v1233_v26  ;;  %v912_v33 = vadd.f32 %v909_v31, %v1634_v0 }
 0x322   : > { %v920_v37 = vsel %vm914_vm2, %v911_v32, %v917_v34 }
 0x323   : > { %vm915_vm4 = vcmp.gt.f32.partialorder %v912_v33, 0.0  ;;  %v918_v35 = vmul.f32 %v912_v33, %v1653_v17  ;;  %v923_v38 = vsel %vm624_vm7, %v920_v37, 0.0  ;;  %v880_v40 = vpop.f32.mrf.mxu0 }
 0x324   : > { %v926_v41 = vpack.c.bf16 %v923_v38, %v923_v38 }
 0x325   : > { %v921_v39 = vsel %vm915_vm4, %v912_v33, %v918_v35 }
 0x326   : > { %v924_v42 = vsel %vm625_vm9, %v921_v39, 0.0  ;;  %v893_v43 = vpop.f32.mrf.mxu1  ;;  %v930_v45 = vsel %vm644_vm8, %v926_v41, 0 }
 0x327   : > { %v927_v44 = vpack.c.bf16 %v924_v42, %v924_v42  ;;  %945 = vmatpush.bf16.msrb.mxu3 %v930_v45 }
 0x329   : > { %v933_v46 = vsel %vm644_vm8, %v927_v44, 0 }
 0x32a   : > { %958 = vmatpush.bf16.msra.mxu0 %v933_v46  ;;  %1237 = vmatmul.msk.bf16.vlgmr.msrb.gmra.mxu3 %vm640_vm15, %v1682_v47 }
 0x32d   : > { %1238 = vmatmul.msk.bf16.vlgmr.msra.gmra.mxu0 %vm640_vm15, %v1682_v47 }
 0x330   : > { %1236 = vmatmul.msk.bf16.vlgmr.msrb.gmra.mxu2 %vm541_vm3, %v1615_v36  ;;  %vm992_vm3 = vcmask 7168  }
 0x379   : > { %v696_v15 = vpop.xlane.xlu2 %695 }
 0x381   : > { %v704_v16 = vpop.xlane.xlu2 %703 }
 0x39d   : > { %v831_v8 = vpop.f32.mrf.mxu3 }
 0x39e   : > { %v842_v51 = vmul.f32 %v831_v8, %v831_v8 }
 0x3a3   : > { %v818_v9 = vpop.f32.mrf.mxu2 }
 0x3a4   : > { %v835_v49 = vadd.f32 %v818_v9, %v805_v2  ;;  %v841_v50 = vmul.f32 %v818_v9, %v818_v9 }
 0x3a5   : > { %v833_v52 = vpop.f32.mrf.mxu3 }
 0x3a6   : > { %v836_v53 = vadd.f32 %v835_v49, %v831_v8  ;;  %v843_v54 = vadd.f32 %v841_v50, %v840_v48 }
 0x3a8   : > { %837 = vadd.xlane.f32.xlu1 %v836_v53  ;;  %v844_v55 = vadd.f32 %v843_v54, %v842_v51 }
 0x3aa   : > { %845 = vadd.xlane.f32.xlu2 %v844_v55  ;;  %v960_v4 = vpop.f32.mrf.mxu0 }
 0x3ab   : > { %v820_v56 = vpop.f32.mrf.mxu2  ;;  %v983_v6 = vmul.f32 %v960_v4, %v960_v4 }
 0x3ad   : > { %v947_v3 = vpop.f32.mrf.mxu3 }
 0x3ae   : > { %v977_v7 = vadd.f32 %v960_v4, %v947_v3 }
 0x3b2   : > { %v962_v5 = vpop.f32.mrf.mxu0 }
 0x3b3   : > { %v904_v57 = vpop.f32.mrf.mxu2 }
 0x3b4   : > { %v910_v58 = vmul.f32 %v904_v57, %v1632_v63 }
 0x3b5   : > { %v949_v63 = vpop.f32.mrf.mxu3 }
 0x3b6   : > { %v913_v59 = vadd.f32 %v910_v58, %v1634_v0  ;;  %v982_v0 = vmul.f32 %v947_v3, %v947_v3 }
 0x3b8   : > { %vm916_vm5 = vcmp.gt.f32.partialorder %v913_v59, 0.0  ;;  %v919_v36 = vmul.f32 %v913_v59, %v1653_v17  ;;  %v985_v17 = vadd.f32 %v983_v6, %v982_v0 }
 0x3ba   : > { %v922_v60 = vsel %vm916_vm5, %v913_v59, %v919_v36 }
 0x3bb   : > { %v906_v61 = vpop.f32.mrf.mxu2  ;;  %v925_v62 = vsel %vm626_vm10, %v922_v60, 0.0 }
 0x3bc   : > { %v928_v1 = vpack.c.bf16 %v925_v62, %v925_v62 }
 0x3be   : > { %v936_v2 = vsel %vm644_vm8, %v928_v1, 0 }
 0x3bf   : > { %971 = vmatpush.bf16.msra.mxu1 %v936_v2 }
 0x3c2   : > { %1239 = vmatmul.msk.bf16.vlgmr.msra.gmra.mxu1 %vm640_vm15, %v1682_v47 }
 0x41b   : > { %v838_v19 = vpop.xlane.xlu1 %837 }
 0x41c   : > { %v839_v47 = vadd.f32 %v838_v19, %v696_v15 }
 0x41d   : > { %v846_v18 = vpop.xlane.xlu2 %845 }
 0x41e   : > { %v847_v22 = vadd.f32 %v846_v18, %v704_v16 }
 0x43f   : > { %v973_v11 = vpop.f32.mrf.mxu1 }
 0x440   : > { %v984_v12 = vmul.f32 %v973_v11, %v973_v11  ;;  %v978_v13 = vadd.f32 %v977_v7, %v973_v11 }
 0x442   : > { %979 = vadd.xlane.f32.xlu0 %v978_v13  ;;  %v986_v10 = vadd.f32 %v985_v17, %v984_v12 }
 0x444   : > { %987 = vadd.xlane.f32.xlu2 %v986_v10 }
 0x447   : > { %v975_v14 = vpop.f32.mrf.mxu1 }
 0x4b5   : > { %v980_v21 = vpop.xlane.xlu0 %979 }
 0x4b6   : > { %v981_v23 = vadd.f32 %v980_v21, %v839_v47 }
 0x4b7   : > { %v988_v25 = vpop.xlane.xlu2 %987 }
 0x4b8   : > { %v991_v26 = vadd.f32 %v990_v20, %v981_v23  ;;  %v989_v27 = vadd.f32 %v988_v25, %v847_v22 }
 0x4ba   : > { %993 = vst.msk [vmem:[#allocation4] sm:$0xff] %vm992_vm3, %v991_v26  ;;  %v995_v28 = vadd.f32 %v994_v24, %v989_v27 }
 0x4bc   : > { %996 = vst.msk [vmem:[#allocation5] sm:$0xff] %vm992_vm3, %v995_v28 }
 0x4bd PF: > { %p997_p6 = scmp.eq.s32.totalorder %s1435_s21, 1 }
 0x4bf   : > { %p998_p7 = pnand %p997_p6, %p490_p4 }
 0x4c0   : > { %s1460_s29 = smov (!%p998_p7), 2   ;;  %s1461_s10 = smov (!%p998_p7), 1  }
 0x4c1   : > { %1001 = sbr.rel (%p998_p7) target bundleno = 1601 (0x641), region = 60  ;;  %s1462_s28 = smov (!%p998_p7), 126  }
 0x4c2   : > { %s1463_s13 = smov (!%p998_p7), 3  }
 0x4c6   : > { %v1027_v29 = vld [vmem:[#allocation4] sm:$0xff]  ;;  %v1029_v30 = vld [vmem:[#allocation5] sm:$0xff]  ;;  %v1002_v31 = vld [vmem:[#allocation2] sm:$0xff]  ;;  %vm1059_vm12 = vcmask 7168   ;;  %vm1061_vm13 = vcmask 15368   ;;  %vm1063_vm14 = vcmask 23568  }
 0x4c7   : > { %v1028_v32 = vmul.f32 0.00055555557, %v1027_v29  ;;  %v1030_v33 = vmul.f32 0.00055555557, %v1029_v30  ;;  %v1003_v34 = vmul.f32 0.00055555557, %v1002_v31 }
 0x4c8   : > { %v1004_v35 = vld [vmem:[#allocation3] sm:$0xff]  ;;  %v1008_v54 = vld [vmem:[%s1789_s3] sm:$0xff]  ;;  %vm1065_vm15 = vcmask 31768  }
 0x4c9   : > { %v1031_v37 = vmul.f32 %v1028_v32, %v1028_v32  ;;  %v1005_v38 = vmul.f32 0.00055555557, %v1004_v35  ;;  %v1006_v39 = vmul.f32 %v1003_v34, %v1003_v34 }
 0x4cb   : > { %v1032_v40 = vsub.f32 %v1030_v33, %v1031_v37  ;;  %v1007_v41 = vsub.f32 %v1005_v38, %v1006_v39 }
 0x4cd   : > { %v1033_v42 = vadd.f32 1e-05, %v1032_v40  ;;  %v1009_v43 = vadd.f32 1e-05, %v1007_v41 }
 0x4cf   : > { %1351 = vrsqrt.f32 %v1033_v42  ;;  %vm1040_vm6 = vweird.f32 %v1033_v42  ;;  %vm1016_vm8 = vweird.f32 %v1009_v43 }
 0x4d0   : > { %1353 = vrsqrt.f32 %v1009_v43 }
 0x4d5   : > { %v1352_v44 = vpop.eup %1351 }
 0x4d6   : > { %v1354_v45 = vpop.eup %1353  ;;  %v1035_v46 = vmul.f32 %v1352_v44, %v1033_v42  ;;  %vm1041_vm7 = vweird.f32 %v1352_v44 }
 0x4d7   : > { %v1011_v8 = vmul.f32 %v1354_v45, %v1009_v43  ;;  %vm1017_vm9 = vweird.f32 %v1354_v45  ;;  %vm1042_vm10 = vmor %vm1040_vm6, %vm1041_vm7 }
 0x4d8   : > { %v1036_v9 = vmul.f32 %v1352_v44, %v1035_v46  ;;  %vm1018_vm11 = vmor %vm1016_vm8, %vm1017_vm9 }
 0x4d9   : > { %v1012_v48 = vmul.f32 %v1354_v45, %v1011_v8 }
 0x4da   : > { %v1037_v49 = vmul.f32 0.5, %v1036_v9 }
 0x4db   : > { %v1013_v50 = vmul.f32 0.5, %v1012_v48 }
 0x4dc   : > { %v1038_v51 = vsub.f32 1.5, %v1037_v49 }
 0x4dd   : > { %v1014_v52 = vsub.f32 1.5, %v1013_v50 }
 0x4de   : > { %v1039_v53 = vmul.f32 %v1352_v44, %v1038_v51 }
 0x4df   : > { %v1015_v55 = vmul.f32 %v1354_v45, %v1014_v52 }
 0x4e0   : > { %v1043_v56 = vsel %vm1042_vm10, %v1352_v44, %v1039_v53 }
 0x4e1   : > { %1045 = vrot.lane.b32.xlu0 %v1043_v56, %s1460_s29  ;;  %v1019_v57 = vsel %vm1018_vm11, %v1354_v45, %v1015_v55 }
 0x4e2   : > { %v1020_v58 = vmul.f32 %v1019_v57, %v1008_v54 }
 0x4e4   : > { %v1021_v59 = vmul.f32 %v1020_v58, %v1003_v34  ;;  %1060 = vst.msk [vmem:[%s1791_s5] sm:$0xff] %vm1059_vm12, %v1020_v58 }
 0x4e6   : > { %1023 = vrot.lane.b32.xlu1 %v1021_v59, %s1461_s10 }
 0x553   : > { %v1046_v36 = vpop.permute.xlu0 %1045 }
 0x554   : > { %v1048_v60 = vmul.f32 %v1046_v36, %v1008_v54 }
 0x556   : > { %1050 = vrot.lane.b32.xlu0 %v1048_v60, %s1462_s28 }
 0x558   : > { %v1024_v61 = vpop.permute.xlu1 %1023 }
 0x559   : > { %v1026_v62 = vsub.f32 %v1008_v54, %v1024_v61 }
 0x55b   : > { %1062 = vst.msk [vmem:[%s1791_s5] sm:$0xff] %vm1061_vm13, %v1026_v62 }
 0x55c   : > { %1064 = vst.msk [vmem:[%s1791_s5] sm:$0xff] %vm1063_vm14, %v1048_v60 }
 0x5c8   : > { %v1051_v1 = vpop.permute.xlu0 %1050 }
 0x5c9   : > { %v1053_v2 = vmul.f32 %v1051_v1, %v1028_v32 }
 0x5cb   : > { %1055 = vrot.lane.b32.xlu1 %v1053_v2, %s1463_s13 }
 0x63d   : > { %v1056_v3 = vpop.permute.xlu1 %1055 }
 0x63e   : > { %v1058_v4 = vsub.f32 %v1008_v54, %v1056_v3 }
 0x640   : > { %1066 = vst.msk [vmem:[%s1791_s5] sm:$0xff] %vm1065_vm15, %v1058_v4 }
 0x641 PF: > { %s18_s25 = sadd.s32 1, %s1451_s25   ;;  %s1794_s16 = sld [smem:[#allocation9_spill]] }
 0x642   : > { %p15_p8 = scmp.ge.s32.totalorder %s18_s25, 6   ;;  %s1795_s18 = smov %s1427_s19 }
 0x643   : > { %s1796_s19 = smov %s1431_s20  ;;  %s1797_s20 = smov %s1548_s6 }
 0x644   : > { %s1798_s21 = smov %s1443_s23  ;;  %s1799_s22 = smov %s1447_s24 }
 0x645   : > { %s1800_s23 = smov %s1803_s27  ;;  %17 = sbr.rel (!%p15_p8) target bundleno = 5 (0x5), region = 96 }
 0x647   : > { %s1801_s24 = smov %s1794_s16 }
 0x64a   :  { %1078 = vsyncpa [#allocation7], 1 }
 0x64b   :  { %1080 = vsyncpa [#allocation7 + $0x1], 1 }

</bundles_post_ra>
